<compile_context>
chip_gen: v5e
topology: v5e:2x2
jax: 0.10.0
libtpu: 0.0.40
codegen_flags: <defaults>
</compile_context>

<pallas_src>
import functools

import jax
import jax.numpy as jnp
from jax import lax
from jax.experimental import pallas as pl
from jax.experimental.pallas import tpu as pltpu

_INV_SQRT2 = 0.7071067811865475


def _gelu_exact(x):
    # nn.GELU() default is the exact (erf) form.
    return 0.5 * x * (1.0 + lax.erf(x * _INV_SQRT2))


# ---------------------------------------------------------------------------
# Fused kernel.  Activation layout: channels-first (Cout, 2L) where columns
# [0, L) hold the even output positions 2m and columns [L, 2L) the odd output
# positions 2m+1 of the length-2L upsampled sequence.
# ---------------------------------------------------------------------------
def _decoder_block_kernel(x_ref, wup_ref, wl_ref, par_ref, o_ref, *,
                          num_layers, eps):
    cout = wl_ref.shape[2]
    L = x_ref.shape[2]
    L2 = 2 * L

    x = x_ref[0].astype(jnp.bfloat16)                       # (Cin, L)

    # ---- hoisted position iotas / shift masks (built once, reused) --------
    pos1 = lax.broadcasted_iota(jnp.int32, (cout, L), 1)
    m_up_l = pos1 >= 1                                      # x[m-1] valid
    m_up_r = pos1 < L - 1                                   # x[m+1] valid
    pos2 = lax.broadcasted_iota(jnp.int32, (cout, L2), 1)
    m_a_l = (pos2 >= 2) & (pos2 < L)                        # od[m-2] -> even half
    m_a_r = pos2 >= L + 1                                   # ev[m-1] -> odd half
    m_b_l = pos2 < L - 1                                    # od[m+1] -> even half
    m_b_r = (pos2 >= L) & (pos2 < L2 - 2)                   # ev[m+2] -> odd half

    b_up = par_ref[:, 0:1]                                  # (Cout, 1)

    # ---- upsample (ConvTranspose1d K=4,s=2,p=1) + folded 1x1 proj ----------
    # One matmul of all four taps; taps placed by rolling the OUTPUTS.
    #   even[m] = M3 x[m-1] + M1 x[m] ; odd[m] = M2 x[m] + M0 x[m+1]
    t = jnp.dot(wup_ref[...], x, preferred_element_type=jnp.float32)  # (4C, L)
    ev = (jnp.where(m_up_l, pltpu.roll(t[0:cout], shift=1, axis=1), 0.0)
          + t[cout:2 * cout] + b_up)
    od = (t[2 * cout:3 * cout]
          + jnp.where(m_up_r,
                      pltpu.roll(t[3 * cout:4 * cout], shift=L - 1, axis=1),
                      0.0)
          + b_up)
    h = jnp.concatenate([ev, od], axis=1)                   # (Cout, 2L) f32

    # ---- num_layers x [dilated conv -> LN(C) -> GELU -> residual] ----------
    # On the interleaved sequence: out[t] = W0 in[t-3] + W1 in[t] + W2 in[t+3]
    # In [ev|od] layout a roll by L+/-k swaps the halves and shifts, so the
    # whole tap placement is 4 rolls + masked adds (no concats, no slicing
    # halves apart).
    inv_c = 1.0 / cout
    for l in range(num_layers):      # static unroll; NL is small (see TODO)
        w = wl_ref[l]                                       # (3C, C) bf16
        b = par_ref[:, 1 + 3 * l:2 + 3 * l]
        g = par_ref[:, 2 + 3 * l:3 + 3 * l]
        bt = par_ref[:, 3 + 3 * l:4 + 3 * l]

        u = jnp.dot(w, h.astype(jnp.bfloat16),
                    preferred_element_type=jnp.float32)     # (3C, 2L)
        u0 = u[0:cout]
        u1 = u[cout:2 * cout]
        u2 = u[2 * cout:3 * cout]
        v = (jnp.where(m_a_l, pltpu.roll(u0, shift=L + 2, axis=1), 0.0)
             + jnp.where(m_a_r, pltpu.roll(u0, shift=L + 1, axis=1), 0.0)
             + u1
             + jnp.where(m_b_l, pltpu.roll(u2, shift=L - 1, axis=1), 0.0)
             + jnp.where(m_b_r, pltpu.roll(u2, shift=L - 2, axis=1), 0.0)
             + b)

        # LayerNorm over channels (axis 0), single pass, then exact GELU.
        mu = jnp.sum(v, axis=0, keepdims=True) * inv_c
        ms = jnp.sum(v * v, axis=0, keepdims=True) * inv_c
        var = jnp.maximum(ms - mu * mu, 0.0)
        vn = (v - mu) * lax.rsqrt(var + eps) * g + bt
        h = h + _gelu_exact(vn)

    o_ref[0, 0] = h[:, 0:L]        # even output positions
    o_ref[0, 1] = h[:, L:L2]       # odd  output positions


# ---------------------------------------------------------------------------
# Host-side weight prep (once): fold 1x1 proj into the ConvTranspose taps,
# stack taps on the matmul-output axis, cast weights to bf16, pack the small
# per-channel vectors into one block.
# ---------------------------------------------------------------------------
def _prep_params(p, num_layers):
    up_w = p["up_w_torch"].astype(jnp.float32)              # (Cin, Cin, 4)
    up_b = p["up_b"].astype(jnp.float32)
    M = jnp.transpose(up_w, (2, 1, 0))                      # M[k] = up_w[:,:,k].T
    if p["proj_w_torch"] is not None:
        P = p["proj_w_torch"][:, :, 0].astype(jnp.float32)  # (Cout, Cin)
        M = jnp.einsum("oc,kci->koi", P, M)                 # (4, Cout, Cin)
        b_eff = P @ up_b + p["proj_b"].astype(jnp.float32)
    else:
        b_eff = up_b
    cout = M.shape[1]
    # Output-shift upsample uses rows [M3; M1; M2; M0].
    w_up = jnp.concatenate([M[3], M[1], M[2], M[0]],
                           axis=0).astype(jnp.bfloat16)     # (4Cout, Cin)

    lw = p["layer_w_torch"].astype(jnp.float32)             # (NL, Cout, Cout, 3)
    w_layers = jnp.concatenate([lw[..., 0], lw[..., 1], lw[..., 2]],
                               axis=1).astype(jnp.bfloat16)  # (NL, 3Cout, Cout)

    cols = [b_eff.reshape(cout, 1)]
    for l in range(num_layers):
        cols += [p["layer_b"][l].reshape(cout, 1),
                 p["gamma"][l].reshape(cout, 1),
                 p["beta"][l].reshape(cout, 1)]
    par = jnp.concatenate(cols, axis=1).astype(jnp.float32)  # (Cout, 1+3NL)
    return w_up, w_layers, par


# ---------------------------------------------------------------------------
# Wrapper.  Module I/O is PyTorch NCL: (B, Cin, L) -> (B, Cout, 2L).
# ---------------------------------------------------------------------------
def decoder_dilated_conv_block(x_ncl, params, *, num_layers=3, eps=1e-5):
    B, Cin, L = x_ncl.shape
    w_up, w_layers, par = _prep_params(params, num_layers)
    Cout = w_layers.shape[2]

    kernel = functools.partial(_decoder_block_kernel,
                               num_layers=num_layers, eps=eps)
    out2 = pl.pallas_call(
        kernel,
        out_shape=jax.ShapeDtypeStruct((B, 2, Cout, L), jnp.float32),
        grid=(B,),
        in_specs=[
            pl.BlockSpec((1, Cin, L), lambda b: (b, 0, 0)),
            pl.BlockSpec((4 * Cout, Cin), lambda b: (0, 0)),
            pl.BlockSpec((num_layers, 3 * Cout, Cout), lambda b: (0, 0, 0)),
            pl.BlockSpec((Cout, 1 + 3 * num_layers), lambda b: (0, 0)),
        ],
        out_specs=pl.BlockSpec((1, 2, Cout, L), lambda b: (b, 0, 0, 0)),
        compiler_params=pltpu.CompilerParams(
            dimension_semantics=("parallel",),
            vmem_limit_bytes=64 * 1024 * 1024),
    )(x_ncl.astype(jnp.float32), w_up, w_layers, par)

    # Interleave even/odd streams into NCL order (single fused XLA copy).
    return jnp.transpose(out2, (0, 2, 3, 1)).reshape(B, Cout, 2 * L)


# ---------------------------------------------------------------------------
# Deterministic parameter construction (PyTorch tensor layouts)
# ---------------------------------------------------------------------------
def make_params(key, cin, cout, num_layers):
    ks = jax.random.split(key, 8)
    p = {}
    p["up_w_torch"] = 0.1 * jax.random.normal(ks[0], (cin, cin, 4), jnp.float32)
    p["up_b"] = 0.1 * jax.random.normal(ks[1], (cin,), jnp.float32)
    if cin != cout:
        p["proj_w_torch"] = 0.1 * jax.random.normal(ks[2], (cout, cin, 1),
                                                    jnp.float32)
        p["proj_b"] = 0.1 * jax.random.normal(ks[3], (cout,), jnp.float32)
    else:
        p["proj_w_torch"] = None
        p["proj_b"] = None
    p["layer_w_torch"] = 0.1 * jax.random.normal(
        ks[4], (num_layers, cout, cout, 3), jnp.float32)
    p["layer_b"] = 0.1 * jax.random.normal(ks[5], (num_layers, cout),
                                           jnp.float32)
    p["gamma"] = 1.0 + 0.1 * jax.random.normal(ks[6], (num_layers, cout),
                                               jnp.float32)
    p["beta"] = 0.1 * jax.random.normal(ks[7], (num_layers, cout), jnp.float32)
    return p


# ---------------------------------------------------------------------------
# Pure-JAX reference (matches the PyTorch module semantics), NCL layout
# ---------------------------------------------------------------------------
def reference_forward(x_ncl, p, *, num_layers=3, eps=1e-5):
    dn = ("NCH", "OIH", "NCH")
    hp = lax.Precision.HIGHEST
    wt = p["up_w_torch"]
    w_conv = jnp.flip(jnp.transpose(wt, (1, 0, 2)), axis=2)
    y = lax.conv_general_dilated(
        x_ncl, w_conv, window_strides=(1,), padding=[(2, 2)],
        lhs_dilation=(2,), dimension_numbers=dn, precision=hp)
    y = y + p["up_b"][None, :, None]
    if p["proj_w_torch"] is not None:
        y = lax.conv_general_dilated(
            y, p["proj_w_torch"], (1,), [(0, 0)],
            dimension_numbers=dn, precision=hp) + p["proj_b"][None, :, None]
    h = y
    for l in range(num_layers):
        out = lax.conv_general_dilated(
            h, p["layer_w_torch"][l], (1,), [(3, 3)], rhs_dilation=(3,),
            dimension_numbers=dn, precision=hp)
        out = out + p["layer_b"][l][None, :, None]
        mu = jnp.mean(out, axis=1, keepdims=True)
        var = jnp.mean((out - mu) ** 2, axis=1, keepdims=True)
        out = ((out - mu) / jnp.sqrt(var + eps) * p["gamma"][l][None, :, None]
               + p["beta"][l][None, :, None])
        out = 0.5 * out * (1.0 + lax.erf(out * _INV_SQRT2))
        h = h + out
    return h


if __name__ == "__main__":
    B, Cin, Cout, L, NL = 2, 8, 16, 16, 3
    key = jax.random.PRNGKey(0)
    kp, kx = jax.random.split(key)
    params = make_params(kp, Cin, Cout, NL)
    x = jax.random.normal(kx, (B, Cin, L), dtype=jnp.float32)

    out = jax.block_until_ready(
        decoder_dilated_conv_block(x, params, num_layers=NL))
    ref = jax.block_until_ready(reference_forward(x, params, num_layers=NL))

    assert out.shape == (B, Cout, 2 * L), out.shape
    max_err = float(jnp.max(jnp.abs(out - ref)))
    # bf16-operand MXU matmuls + LayerNorm amplification over 3 residual
    # layers -> compare at bf16-class tolerance against the f32 HIGHEST ref.
    if not jnp.allclose(out, ref, rtol=2e-2, atol=3e-2):
        raise AssertionError(f"Pallas kernel mismatch, max abs err = {max_err}")
    print("KERNEL_OK")
</pallas_src>

<mosaic_0001>
module attributes {stable_mosaic.version = 11 : i64} {
  func.func @_decoder_block_kernel(%arg0: i32, %arg1: memref<1x8x16xf32, #tpu.memory_space<vmem>>, %arg2: memref<64x8xbf16, #tpu.memory_space<vmem>>, %arg3: memref<3x48x16xbf16, #tpu.memory_space<vmem>>, %arg4: memref<16x10xf32, #tpu.memory_space<vmem>>, %arg5: memref<1x2x16x16xf32, #tpu.memory_space<vmem>>) attributes {dimension_semantics = [#tpu.dimension_semantics<parallel>], iteration_bounds = array<i64: 2>, scalar_prefetch = 0 : i64, scratch_operands = 0 : i64, tpu.core_type = #tpu.core_type<tc>, window_params = [{transform_indices = @transform_0, window_bounds = array<i64: 1, 8, 16>}, {pipeline_mode = #tpu.pipeline_mode<synchronous>, transform_indices = @transform_1, window_bounds = array<i64: 64, 8>}, {pipeline_mode = #tpu.pipeline_mode<synchronous>, transform_indices = @transform_2, window_bounds = array<i64: 3, 48, 16>}, {pipeline_mode = #tpu.pipeline_mode<synchronous>, transform_indices = @transform_3, window_bounds = array<i64: 16, 10>}, {transform_indices = @transform_4, window_bounds = array<i64: 1, 2, 16, 16>}]} {
    %c0 = arith.constant 0 : index
    %c0_0 = arith.constant 0 : index
    %c0_1 = arith.constant 0 : index
    %0 = vector.load %arg1[%c0, %c0_0, %c0_1] : memref<1x8x16xf32, #tpu.memory_space<vmem>>, vector<1x8x16xf32>
    %1 = vector.shape_cast %0 : vector<1x8x16xf32> to vector<8x16xf32>
    %2 = arith.truncf %1 : vector<8x16xf32> to vector<8x16xbf16>
    %3 = tpu.iota {dimensions = array<i32: 1>} : vector<16x16xi32>
    %c1_i32 = arith.constant 1 : i32
    %4 = vector.broadcast %c1_i32 : i32 to vector<16x16xi32>
    %5 = arith.cmpi sge, %3, %4 : vector<16x16xi32>
    %c15_i32 = arith.constant 15 : i32
    %6 = vector.broadcast %c15_i32 : i32 to vector<16x16xi32>
    %7 = arith.cmpi slt, %3, %6 : vector<16x16xi32>
    %8 = tpu.iota {dimensions = array<i32: 1>} : vector<16x32xi32>
    %c2_i32 = arith.constant 2 : i32
    %9 = vector.broadcast %c2_i32 : i32 to vector<16x32xi32>
    %10 = arith.cmpi sge, %8, %9 : vector<16x32xi32>
    %c16_i32 = arith.constant 16 : i32
    %11 = vector.broadcast %c16_i32 : i32 to vector<16x32xi32>
    %12 = arith.cmpi slt, %8, %11 : vector<16x32xi32>
    %13 = arith.andi %10, %12 : vector<16x32xi1>
    %c17_i32 = arith.constant 17 : i32
    %14 = vector.broadcast %c17_i32 : i32 to vector<16x32xi32>
    %15 = arith.cmpi sge, %8, %14 : vector<16x32xi32>
    %c15_i32_2 = arith.constant 15 : i32
    %16 = vector.broadcast %c15_i32_2 : i32 to vector<16x32xi32>
    %17 = arith.cmpi slt, %8, %16 : vector<16x32xi32>
    %c16_i32_3 = arith.constant 16 : i32
    %18 = vector.broadcast %c16_i32_3 : i32 to vector<16x32xi32>
    %19 = arith.cmpi sge, %8, %18 : vector<16x32xi32>
    %c30_i32 = arith.constant 30 : i32
    %20 = vector.broadcast %c30_i32 : i32 to vector<16x32xi32>
    %21 = arith.cmpi slt, %8, %20 : vector<16x32xi32>
    %22 = arith.andi %19, %21 : vector<16x32xi1>
    %c0_4 = arith.constant 0 : index
    %c0_5 = arith.constant 0 : index
    %23 = vector.load %arg4[%c0_4, %c0_5] : memref<16x10xf32, #tpu.memory_space<vmem>>, vector<16x1xf32>
    %c0_6 = arith.constant 0 : index
    %c0_7 = arith.constant 0 : index
    %24 = vector.load %arg2[%c0_6, %c0_7] : memref<64x8xbf16, #tpu.memory_space<vmem>>, vector<64x8xbf16>
    %cst = arith.constant dense<0.000000e+00> : vector<64x16xf32>
    %25 = tpu.matmul %24, %2, %cst {dimension_numbers = #tpu.dot_dimension_numbers<[1], [0], [0], [1], [0, 0, 1, 1], [], []>} : vector<64x8xbf16>, vector<8x16xbf16>, vector<64x16xf32> -> vector<64x16xf32>
    %26 = vector.extract_strided_slice %25 {offsets = [0, 0], sizes = [16, 16], strides = [1, 1]} : vector<64x16xf32> to vector<16x16xf32>
    %c1_i32_8 = arith.constant 1 : i32
    %27 = tpu.dynamic_rotate %26 by %c1_i32_8 dim 1 : vector<16x16xf32>, i32 -> vector<16x16xf32>
    %cst_9 = arith.constant 0.000000e+00 : f32
    %28 = vector.broadcast %cst_9 : f32 to vector<16x16xf32>
    %29 = arith.select %5, %27, %28 : vector<16x16xi1>, vector<16x16xf32>
    %30 = vector.extract_strided_slice %25 {offsets = [16, 0], sizes = [16, 16], strides = [1, 1]} : vector<64x16xf32> to vector<16x16xf32>
    %31 = arith.addf %29, %30 : vector<16x16xf32>
    %32 = vector.broadcast %23 : vector<16x1xf32> to vector<16x16xf32>
    %33 = arith.addf %31, %32 : vector<16x16xf32>
    %34 = vector.extract_strided_slice %25 {offsets = [32, 0], sizes = [16, 16], strides = [1, 1]} : vector<64x16xf32> to vector<16x16xf32>
    %35 = vector.extract_strided_slice %25 {offsets = [48, 0], sizes = [16, 16], strides = [1, 1]} : vector<64x16xf32> to vector<16x16xf32>
    %c15_i32_10 = arith.constant 15 : i32
    %36 = tpu.dynamic_rotate %35 by %c15_i32_10 dim 1 : vector<16x16xf32>, i32 -> vector<16x16xf32>
    %cst_11 = arith.constant 0.000000e+00 : f32
    %37 = vector.broadcast %cst_11 : f32 to vector<16x16xf32>
    %38 = arith.select %7, %36, %37 : vector<16x16xi1>, vector<16x16xf32>
    %39 = arith.addf %34, %38 : vector<16x16xf32>
    %40 = vector.broadcast %23 : vector<16x1xf32> to vector<16x16xf32>
    %41 = arith.addf %39, %40 : vector<16x16xf32>
    %42 = tpu.concatenate %33, %41 in 1 : vector<16x16xf32>, vector<16x16xf32> -> vector<16x32xf32>
    %c0_12 = arith.constant 0 : index
    %c0_13 = arith.constant 0 : index
    %c0_14 = arith.constant 0 : index
    %43 = vector.load %arg3[%c0_12, %c0_13, %c0_14] : memref<3x48x16xbf16, #tpu.memory_space<vmem>>, vector<1x48x16xbf16>
    %44 = vector.shape_cast %43 : vector<1x48x16xbf16> to vector<48x16xbf16>
    %c0_15 = arith.constant 0 : index
    %c1 = arith.constant 1 : index
    %45 = vector.load %arg4[%c0_15, %c1] : memref<16x10xf32, #tpu.memory_space<vmem>>, vector<16x1xf32>
    %c0_16 = arith.constant 0 : index
    %c2 = arith.constant 2 : index
    %46 = vector.load %arg4[%c0_16, %c2] : memref<16x10xf32, #tpu.memory_space<vmem>>, vector<16x1xf32>
    %c0_17 = arith.constant 0 : index
    %c3 = arith.constant 3 : index
    %47 = vector.load %arg4[%c0_17, %c3] : memref<16x10xf32, #tpu.memory_space<vmem>>, vector<16x1xf32>
    %48 = arith.truncf %42 : vector<16x32xf32> to vector<16x32xbf16>
    %cst_18 = arith.constant dense<0.000000e+00> : vector<48x32xf32>
    %49 = tpu.matmul %44, %48, %cst_18 {dimension_numbers = #tpu.dot_dimension_numbers<[1], [0], [0], [1], [0, 0, 1, 1], [], []>} : vector<48x16xbf16>, vector<16x32xbf16>, vector<48x32xf32> -> vector<48x32xf32>
    %50 = vector.extract_strided_slice %49 {offsets = [0, 0], sizes = [16, 32], strides = [1, 1]} : vector<48x32xf32> to vector<16x32xf32>
    %51 = vector.extract_strided_slice %49 {offsets = [16, 0], sizes = [16, 32], strides = [1, 1]} : vector<48x32xf32> to vector<16x32xf32>
    %52 = vector.extract_strided_slice %49 {offsets = [32, 0], sizes = [16, 32], strides = [1, 1]} : vector<48x32xf32> to vector<16x32xf32>
    %c18_i32 = arith.constant 18 : i32
    %53 = tpu.dynamic_rotate %50 by %c18_i32 dim 1 : vector<16x32xf32>, i32 -> vector<16x32xf32>
    %cst_19 = arith.constant 0.000000e+00 : f32
    %54 = vector.broadcast %cst_19 : f32 to vector<16x32xf32>
    %55 = arith.select %13, %53, %54 : vector<16x32xi1>, vector<16x32xf32>
    %c17_i32_20 = arith.constant 17 : i32
    %56 = tpu.dynamic_rotate %50 by %c17_i32_20 dim 1 : vector<16x32xf32>, i32 -> vector<16x32xf32>
    %cst_21 = arith.constant 0.000000e+00 : f32
    %57 = vector.broadcast %cst_21 : f32 to vector<16x32xf32>
    %58 = arith.select %15, %56, %57 : vector<16x32xi1>, vector<16x32xf32>
    %59 = arith.addf %55, %58 : vector<16x32xf32>
    %60 = arith.addf %59, %51 : vector<16x32xf32>
    %c15_i32_22 = arith.constant 15 : i32
    %61 = tpu.dynamic_rotate %52 by %c15_i32_22 dim 1 : vector<16x32xf32>, i32 -> vector<16x32xf32>
    %cst_23 = arith.constant 0.000000e+00 : f32
    %62 = vector.broadcast %cst_23 : f32 to vector<16x32xf32>
    %63 = arith.select %17, %61, %62 : vector<16x32xi1>, vector<16x32xf32>
    %64 = arith.addf %60, %63 : vector<16x32xf32>
    %c14_i32 = arith.constant 14 : i32
    %65 = tpu.dynamic_rotate %52 by %c14_i32 dim 1 : vector<16x32xf32>, i32 -> vector<16x32xf32>
    %cst_24 = arith.constant 0.000000e+00 : f32
    %66 = vector.broadcast %cst_24 : f32 to vector<16x32xf32>
    %67 = arith.select %22, %65, %66 : vector<16x32xi1>, vector<16x32xf32>
    %68 = arith.addf %64, %67 : vector<16x32xf32>
    %69 = vector.broadcast %45 : vector<16x1xf32> to vector<16x32xf32>
    %70 = arith.addf %68, %69 : vector<16x32xf32>
    %cst_25 = arith.constant dense<0.000000e+00> : vector<32xf32>
    %71 = vector.multi_reduction <add>, %70, %cst_25 [0] : vector<16x32xf32> to vector<32xf32>
    %72 = vector.shape_cast %71 : vector<32xf32> to vector<1x32xf32>
    %cst_26 = arith.constant 6.250000e-02 : f32
    %73 = vector.broadcast %cst_26 : f32 to vector<1x32xf32>
    %74 = arith.mulf %72, %73 : vector<1x32xf32>
    %75 = arith.mulf %70, %70 : vector<16x32xf32>
    %cst_27 = arith.constant dense<0.000000e+00> : vector<32xf32>
    %76 = vector.multi_reduction <add>, %75, %cst_27 [0] : vector<16x32xf32> to vector<32xf32>
    %77 = vector.shape_cast %76 : vector<32xf32> to vector<1x32xf32>
    %cst_28 = arith.constant 6.250000e-02 : f32
    %78 = vector.broadcast %cst_28 : f32 to vector<1x32xf32>
    %79 = arith.mulf %77, %78 : vector<1x32xf32>
    %80 = arith.mulf %74, %74 : vector<1x32xf32>
    %81 = arith.subf %79, %80 : vector<1x32xf32>
    %cst_29 = arith.constant 0.000000e+00 : f32
    %82 = vector.broadcast %cst_29 : f32 to vector<1x32xf32>
    %83 = arith.maximumf %81, %82 : vector<1x32xf32>
    %84 = vector.broadcast %74 : vector<1x32xf32> to vector<16x32xf32>
    %85 = arith.subf %70, %84 : vector<16x32xf32>
    %cst_30 = arith.constant 9.99999974E-6 : f32
    %86 = vector.broadcast %cst_30 : f32 to vector<1x32xf32>
    %87 = arith.addf %83, %86 : vector<1x32xf32>
    %88 = math.rsqrt %87 : vector<1x32xf32>
    %89 = vector.broadcast %88 : vector<1x32xf32> to vector<16x32xf32>
    %90 = arith.mulf %85, %89 : vector<16x32xf32>
    %91 = vector.broadcast %46 : vector<16x1xf32> to vector<16x32xf32>
    %92 = arith.mulf %90, %91 : vector<16x32xf32>
    %93 = vector.broadcast %47 : vector<16x1xf32> to vector<16x32xf32>
    %94 = arith.addf %92, %93 : vector<16x32xf32>
    %cst_31 = arith.constant 5.000000e-01 : f32
    %95 = vector.broadcast %cst_31 : f32 to vector<16x32xf32>
    %96 = arith.mulf %95, %94 : vector<16x32xf32>
    %cst_32 = arith.constant 0.707106769 : f32
    %97 = vector.broadcast %cst_32 : f32 to vector<16x32xf32>
    %98 = arith.mulf %94, %97 : vector<16x32xf32>
    %99 = math.erf %98 : vector<16x32xf32>
    %cst_33 = arith.constant 1.000000e+00 : f32
    %100 = vector.broadcast %cst_33 : f32 to vector<16x32xf32>
    %101 = arith.addf %100, %99 : vector<16x32xf32>
    %102 = arith.mulf %96, %101 : vector<16x32xf32>
    %103 = arith.addf %42, %102 : vector<16x32xf32>
    %c1_34 = arith.constant 1 : index
    %c0_35 = arith.constant 0 : index
    %c0_36 = arith.constant 0 : index
    %104 = vector.load %arg3[%c1_34, %c0_35, %c0_36] : memref<3x48x16xbf16, #tpu.memory_space<vmem>>, vector<1x48x16xbf16>
    %105 = vector.shape_cast %104 : vector<1x48x16xbf16> to vector<48x16xbf16>
    %c0_37 = arith.constant 0 : index
    %c4 = arith.constant 4 : index
    %106 = vector.load %arg4[%c0_37, %c4] : memref<16x10xf32, #tpu.memory_space<vmem>>, vector<16x1xf32>
    %c0_38 = arith.constant 0 : index
    %c5 = arith.constant 5 : index
    %107 = vector.load %arg4[%c0_38, %c5] : memref<16x10xf32, #tpu.memory_space<vmem>>, vector<16x1xf32>
    %c0_39 = arith.constant 0 : index
    %c6 = arith.constant 6 : index
    %108 = vector.load %arg4[%c0_39, %c6] : memref<16x10xf32, #tpu.memory_space<vmem>>, vector<16x1xf32>
    %109 = arith.truncf %103 : vector<16x32xf32> to vector<16x32xbf16>
    %cst_40 = arith.constant dense<0.000000e+00> : vector<48x32xf32>
    %110 = tpu.matmul %105, %109, %cst_40 {dimension_numbers = #tpu.dot_dimension_numbers<[1], [0], [0], [1], [0, 0, 1, 1], [], []>} : vector<48x16xbf16>, vector<16x32xbf16>, vector<48x32xf32> -> vector<48x32xf32>
    %111 = vector.extract_strided_slice %110 {offsets = [0, 0], sizes = [16, 32], strides = [1, 1]} : vector<48x32xf32> to vector<16x32xf32>
    %112 = vector.extract_strided_slice %110 {offsets = [16, 0], sizes = [16, 32], strides = [1, 1]} : vector<48x32xf32> to vector<16x32xf32>
    %113 = vector.extract_strided_slice %110 {offsets = [32, 0], sizes = [16, 32], strides = [1, 1]} : vector<48x32xf32> to vector<16x32xf32>
    %c18_i32_41 = arith.constant 18 : i32
    %114 = tpu.dynamic_rotate %111 by %c18_i32_41 dim 1 : vector<16x32xf32>, i32 -> vector<16x32xf32>
    %cst_42 = arith.constant 0.000000e+00 : f32
    %115 = vector.broadcast %cst_42 : f32 to vector<16x32xf32>
    %116 = arith.select %13, %114, %115 : vector<16x32xi1>, vector<16x32xf32>
    %c17_i32_43 = arith.constant 17 : i32
    %117 = tpu.dynamic_rotate %111 by %c17_i32_43 dim 1 : vector<16x32xf32>, i32 -> vector<16x32xf32>
    %cst_44 = arith.constant 0.000000e+00 : f32
    %118 = vector.broadcast %cst_44 : f32 to vector<16x32xf32>
    %119 = arith.select %15, %117, %118 : vector<16x32xi1>, vector<16x32xf32>
    %120 = arith.addf %116, %119 : vector<16x32xf32>
    %121 = arith.addf %120, %112 : vector<16x32xf32>
    %c15_i32_45 = arith.constant 15 : i32
    %122 = tpu.dynamic_rotate %113 by %c15_i32_45 dim 1 : vector<16x32xf32>, i32 -> vector<16x32xf32>
    %cst_46 = arith.constant 0.000000e+00 : f32
    %123 = vector.broadcast %cst_46 : f32 to vector<16x32xf32>
    %124 = arith.select %17, %122, %123 : vector<16x32xi1>, vector<16x32xf32>
    %125 = arith.addf %121, %124 : vector<16x32xf32>
    %c14_i32_47 = arith.constant 14 : i32
    %126 = tpu.dynamic_rotate %113 by %c14_i32_47 dim 1 : vector<16x32xf32>, i32 -> vector<16x32xf32>
    %cst_48 = arith.constant 0.000000e+00 : f32
    %127 = vector.broadcast %cst_48 : f32 to vector<16x32xf32>
    %128 = arith.select %22, %126, %127 : vector<16x32xi1>, vector<16x32xf32>
    %129 = arith.addf %125, %128 : vector<16x32xf32>
    %130 = vector.broadcast %106 : vector<16x1xf32> to vector<16x32xf32>
    %131 = arith.addf %129, %130 : vector<16x32xf32>
    %cst_49 = arith.constant dense<0.000000e+00> : vector<32xf32>
    %132 = vector.multi_reduction <add>, %131, %cst_49 [0] : vector<16x32xf32> to vector<32xf32>
    %133 = vector.shape_cast %132 : vector<32xf32> to vector<1x32xf32>
    %cst_50 = arith.constant 6.250000e-02 : f32
    %134 = vector.broadcast %cst_50 : f32 to vector<1x32xf32>
    %135 = arith.mulf %133, %134 : vector<1x32xf32>
    %136 = arith.mulf %131, %131 : vector<16x32xf32>
    %cst_51 = arith.constant dense<0.000000e+00> : vector<32xf32>
    %137 = vector.multi_reduction <add>, %136, %cst_51 [0] : vector<16x32xf32> to vector<32xf32>
    %138 = vector.shape_cast %137 : vector<32xf32> to vector<1x32xf32>
    %cst_52 = arith.constant 6.250000e-02 : f32
    %139 = vector.broadcast %cst_52 : f32 to vector<1x32xf32>
    %140 = arith.mulf %138, %139 : vector<1x32xf32>
    %141 = arith.mulf %135, %135 : vector<1x32xf32>
    %142 = arith.subf %140, %141 : vector<1x32xf32>
    %cst_53 = arith.constant 0.000000e+00 : f32
    %143 = vector.broadcast %cst_53 : f32 to vector<1x32xf32>
    %144 = arith.maximumf %142, %143 : vector<1x32xf32>
    %145 = vector.broadcast %135 : vector<1x32xf32> to vector<16x32xf32>
    %146 = arith.subf %131, %145 : vector<16x32xf32>
    %cst_54 = arith.constant 9.99999974E-6 : f32
    %147 = vector.broadcast %cst_54 : f32 to vector<1x32xf32>
    %148 = arith.addf %144, %147 : vector<1x32xf32>
    %149 = math.rsqrt %148 : vector<1x32xf32>
    %150 = vector.broadcast %149 : vector<1x32xf32> to vector<16x32xf32>
    %151 = arith.mulf %146, %150 : vector<16x32xf32>
    %152 = vector.broadcast %107 : vector<16x1xf32> to vector<16x32xf32>
    %153 = arith.mulf %151, %152 : vector<16x32xf32>
    %154 = vector.broadcast %108 : vector<16x1xf32> to vector<16x32xf32>
    %155 = arith.addf %153, %154 : vector<16x32xf32>
    %cst_55 = arith.constant 5.000000e-01 : f32
    %156 = vector.broadcast %cst_55 : f32 to vector<16x32xf32>
    %157 = arith.mulf %156, %155 : vector<16x32xf32>
    %cst_56 = arith.constant 0.707106769 : f32
    %158 = vector.broadcast %cst_56 : f32 to vector<16x32xf32>
    %159 = arith.mulf %155, %158 : vector<16x32xf32>
    %160 = math.erf %159 : vector<16x32xf32>
    %cst_57 = arith.constant 1.000000e+00 : f32
    %161 = vector.broadcast %cst_57 : f32 to vector<16x32xf32>
    %162 = arith.addf %161, %160 : vector<16x32xf32>
    %163 = arith.mulf %157, %162 : vector<16x32xf32>
    %164 = arith.addf %103, %163 : vector<16x32xf32>
    %c2_58 = arith.constant 2 : index
    %c0_59 = arith.constant 0 : index
    %c0_60 = arith.constant 0 : index
    %165 = vector.load %arg3[%c2_58, %c0_59, %c0_60] : memref<3x48x16xbf16, #tpu.memory_space<vmem>>, vector<1x48x16xbf16>
    %166 = vector.shape_cast %165 : vector<1x48x16xbf16> to vector<48x16xbf16>
    %c0_61 = arith.constant 0 : index
    %c7 = arith.constant 7 : index
    %167 = vector.load %arg4[%c0_61, %c7] : memref<16x10xf32, #tpu.memory_space<vmem>>, vector<16x1xf32>
    %c0_62 = arith.constant 0 : index
    %c8 = arith.constant 8 : index
    %168 = vector.load %arg4[%c0_62, %c8] : memref<16x10xf32, #tpu.memory_space<vmem>>, vector<16x1xf32>
    %c0_63 = arith.constant 0 : index
    %c9 = arith.constant 9 : index
    %169 = vector.load %arg4[%c0_63, %c9] : memref<16x10xf32, #tpu.memory_space<vmem>>, vector<16x1xf32>
    %170 = arith.truncf %164 : vector<16x32xf32> to vector<16x32xbf16>
    %cst_64 = arith.constant dense<0.000000e+00> : vector<48x32xf32>
    %171 = tpu.matmul %166, %170, %cst_64 {dimension_numbers = #tpu.dot_dimension_numbers<[1], [0], [0], [1], [0, 0, 1, 1], [], []>} : vector<48x16xbf16>, vector<16x32xbf16>, vector<48x32xf32> -> vector<48x32xf32>
    %172 = vector.extract_strided_slice %171 {offsets = [0, 0], sizes = [16, 32], strides = [1, 1]} : vector<48x32xf32> to vector<16x32xf32>
    %173 = vector.extract_strided_slice %171 {offsets = [16, 0], sizes = [16, 32], strides = [1, 1]} : vector<48x32xf32> to vector<16x32xf32>
    %174 = vector.extract_strided_slice %171 {offsets = [32, 0], sizes = [16, 32], strides = [1, 1]} : vector<48x32xf32> to vector<16x32xf32>
    %c18_i32_65 = arith.constant 18 : i32
    %175 = tpu.dynamic_rotate %172 by %c18_i32_65 dim 1 : vector<16x32xf32>, i32 -> vector<16x32xf32>
    %cst_66 = arith.constant 0.000000e+00 : f32
    %176 = vector.broadcast %cst_66 : f32 to vector<16x32xf32>
    %177 = arith.select %13, %175, %176 : vector<16x32xi1>, vector<16x32xf32>
    %c17_i32_67 = arith.constant 17 : i32
    %178 = tpu.dynamic_rotate %172 by %c17_i32_67 dim 1 : vector<16x32xf32>, i32 -> vector<16x32xf32>
    %cst_68 = arith.constant 0.000000e+00 : f32
    %179 = vector.broadcast %cst_68 : f32 to vector<16x32xf32>
    %180 = arith.select %15, %178, %179 : vector<16x32xi1>, vector<16x32xf32>
    %181 = arith.addf %177, %180 : vector<16x32xf32>
    %182 = arith.addf %181, %173 : vector<16x32xf32>
    %c15_i32_69 = arith.constant 15 : i32
    %183 = tpu.dynamic_rotate %174 by %c15_i32_69 dim 1 : vector<16x32xf32>, i32 -> vector<16x32xf32>
    %cst_70 = arith.constant 0.000000e+00 : f32
    %184 = vector.broadcast %cst_70 : f32 to vector<16x32xf32>
    %185 = arith.select %17, %183, %184 : vector<16x32xi1>, vector<16x32xf32>
    %186 = arith.addf %182, %185 : vector<16x32xf32>
    %c14_i32_71 = arith.constant 14 : i32
    %187 = tpu.dynamic_rotate %174 by %c14_i32_71 dim 1 : vector<16x32xf32>, i32 -> vector<16x32xf32>
    %cst_72 = arith.constant 0.000000e+00 : f32
    %188 = vector.broadcast %cst_72 : f32 to vector<16x32xf32>
    %189 = arith.select %22, %187, %188 : vector<16x32xi1>, vector<16x32xf32>
    %190 = arith.addf %186, %189 : vector<16x32xf32>
    %191 = vector.broadcast %167 : vector<16x1xf32> to vector<16x32xf32>
    %192 = arith.addf %190, %191 : vector<16x32xf32>
    %cst_73 = arith.constant dense<0.000000e+00> : vector<32xf32>
    %193 = vector.multi_reduction <add>, %192, %cst_73 [0] : vector<16x32xf32> to vector<32xf32>
    %194 = vector.shape_cast %193 : vector<32xf32> to vector<1x32xf32>
    %cst_74 = arith.constant 6.250000e-02 : f32
    %195 = vector.broadcast %cst_74 : f32 to vector<1x32xf32>
    %196 = arith.mulf %194, %195 : vector<1x32xf32>
    %197 = arith.mulf %192, %192 : vector<16x32xf32>
    %cst_75 = arith.constant dense<0.000000e+00> : vector<32xf32>
    %198 = vector.multi_reduction <add>, %197, %cst_75 [0] : vector<16x32xf32> to vector<32xf32>
    %199 = vector.shape_cast %198 : vector<32xf32> to vector<1x32xf32>
    %cst_76 = arith.constant 6.250000e-02 : f32
    %200 = vector.broadcast %cst_76 : f32 to vector<1x32xf32>
    %201 = arith.mulf %199, %200 : vector<1x32xf32>
    %202 = arith.mulf %196, %196 : vector<1x32xf32>
    %203 = arith.subf %201, %202 : vector<1x32xf32>
    %cst_77 = arith.constant 0.000000e+00 : f32
    %204 = vector.broadcast %cst_77 : f32 to vector<1x32xf32>
    %205 = arith.maximumf %203, %204 : vector<1x32xf32>
    %206 = vector.broadcast %196 : vector<1x32xf32> to vector<16x32xf32>
    %207 = arith.subf %192, %206 : vector<16x32xf32>
    %cst_78 = arith.constant 9.99999974E-6 : f32
    %208 = vector.broadcast %cst_78 : f32 to vector<1x32xf32>
    %209 = arith.addf %205, %208 : vector<1x32xf32>
    %210 = math.rsqrt %209 : vector<1x32xf32>
    %211 = vector.broadcast %210 : vector<1x32xf32> to vector<16x32xf32>
    %212 = arith.mulf %207, %211 : vector<16x32xf32>
    %213 = vector.broadcast %168 : vector<16x1xf32> to vector<16x32xf32>
    %214 = arith.mulf %212, %213 : vector<16x32xf32>
    %215 = vector.broadcast %169 : vector<16x1xf32> to vector<16x32xf32>
    %216 = arith.addf %214, %215 : vector<16x32xf32>
    %cst_79 = arith.constant 5.000000e-01 : f32
    %217 = vector.broadcast %cst_79 : f32 to vector<16x32xf32>
    %218 = arith.mulf %217, %216 : vector<16x32xf32>
    %cst_80 = arith.constant 0.707106769 : f32
    %219 = vector.broadcast %cst_80 : f32 to vector<16x32xf32>
    %220 = arith.mulf %216, %219 : vector<16x32xf32>
    %221 = math.erf %220 : vector<16x32xf32>
    %cst_81 = arith.constant 1.000000e+00 : f32
    %222 = vector.broadcast %cst_81 : f32 to vector<16x32xf32>
    %223 = arith.addf %222, %221 : vector<16x32xf32>
    %224 = arith.mulf %218, %223 : vector<16x32xf32>
    %225 = arith.addf %164, %224 : vector<16x32xf32>
    %226 = vector.extract_strided_slice %225 {offsets = [0, 0], sizes = [16, 16], strides = [1, 1]} : vector<16x32xf32> to vector<16x16xf32>
    %c0_82 = arith.constant 0 : index
    %c0_83 = arith.constant 0 : index
    %c0_84 = arith.constant 0 : index
    %c0_85 = arith.constant 0 : index
    %227 = vector.load %arg5[%c0_82, %c0_83, %c0_84, %c0_85] : memref<1x2x16x16xf32, #tpu.memory_space<vmem>>, vector<1x1x16x16xf32>
    %228 = vector.shape_cast %227 : vector<1x1x16x16xf32> to vector<16x16xf32>
    %229 = vector.shape_cast %226 : vector<16x16xf32> to vector<1x1x16x16xf32>
    tpu.vector_store %arg5[%c0_82, %c0_83, %c0_84, %c0_85], %229 {strides = array<i32>} : memref<1x2x16x16xf32, #tpu.memory_space<vmem>>, vector<1x1x16x16xf32>,
    %230 = vector.extract_strided_slice %225 {offsets = [0, 16], sizes = [16, 16], strides = [1, 1]} : vector<16x32xf32> to vector<16x16xf32>
    %c0_86 = arith.constant 0 : index
    %c1_87 = arith.constant 1 : index
    %c0_88 = arith.constant 0 : index
    %c0_89 = arith.constant 0 : index
    %231 = vector.load %arg5[%c0_86, %c1_87, %c0_88, %c0_89] : memref<1x2x16x16xf32, #tpu.memory_space<vmem>>, vector<1x1x16x16xf32>
    %232 = vector.shape_cast %231 : vector<1x1x16x16xf32> to vector<16x16xf32>
    %233 = vector.shape_cast %230 : vector<16x16xf32> to vector<1x1x16x16xf32>
    tpu.vector_store %arg5[%c0_86, %c1_87, %c0_88, %c0_89], %233 {strides = array<i32>} : memref<1x2x16x16xf32, #tpu.memory_space<vmem>>, vector<1x1x16x16xf32>,
    return
  }
  func.func @transform_0(%arg0: i32) -> (i32, i32, i32) {
    %c0_i32 = arith.constant 0 : i32
    %c0_i32_0 = arith.constant 0 : i32
    %c0_i32_1 = arith.constant 0 : i32
    return %arg0, %c0_i32, %c0_i32_0 : i32, i32, i32
  }
  func.func @transform_1(%arg0: i32) -> (i32, i32) {
    %c0_i32 = arith.constant 0 : i32
    %c0_i32_0 = arith.constant 0 : i32
    %c0_i32_1 = arith.constant 0 : i32
    return %c0_i32, %c0_i32_0 : i32, i32
  }
  func.func @transform_2(%arg0: i32) -> (i32, i32, i32) {
    %c0_i32 = arith.constant 0 : i32
    %c0_i32_0 = arith.constant 0 : i32
    %c0_i32_1 = arith.constant 0 : i32
    %c0_i32_2 = arith.constant 0 : i32
    return %c0_i32, %c0_i32_0, %c0_i32_1 : i32, i32, i32
  }
  func.func @transform_3(%arg0: i32) -> (i32, i32) {
    %c0_i32 = arith.constant 0 : i32
    %c0_i32_0 = arith.constant 0 : i32
    %c0_i32_1 = arith.constant 0 : i32
    return %c0_i32, %c0_i32_0 : i32, i32
  }
  func.func @transform_4(%arg0: i32) -> (i32, i32, i32, i32) {
    %c0_i32 = arith.constant 0 : i32
    %c0_i32_0 = arith.constant 0 : i32
    %c0_i32_1 = arith.constant 0 : i32
    %c0_i32_2 = arith.constant 0 : i32
    return %arg0, %c0_i32, %c0_i32_0, %c0_i32_1 : i32, i32, i32, i32
  }
}

</mosaic_0001>

<bundles_post_ra>
// kernel: tpu_custom_call.1
= control target key start
LH: loop header
LB: loop body
LE: loop exit
PB: predicated region body
PF: predicated region fallthrough
CT: control target
= control target key end

     0   :  { %9 = vsyncpa [#allocation3], 0  ;;  %s2057_s0 = inlined_call_operand.vmem [shape: f32[2,8,16], index: 0, kind: input, shape index: {}]   ;;  %s2058_s1 = inlined_call_operand.vmem [shape: bf16[64,8], index: 1, kind: input, shape index: {}]   ;;  %s2059_s2 = inlined_call_operand.vmem [shape: bf16[3,48,16], index: 2, kind: input, shape index: {}]   ;;  %s2060_s3 = inlined_call_operand.vmem [shape: f32[16,10], index: 3, kind: input, shape index: {}]   ;;  %s2061_s4 = inlined_call_operand.hbm [shape: f32[2,2,16,16], index: 4, kind: output, shape index: {}]  }
   0x1   :  { %11 = vsyncpa [#allocation3 + $0x1], 0  ;;  %s1619_s15 = smov 0   ;;  %s1621_s16 = smov 0  }
   0x2   :  { %s1623_s17 = smov 0   ;;  %s1625_s18 = smov 0  }
   0x3 LB: > { %s1640_s19 = sadd.s32 4294967295, %s1572_s18   ;;  %s1301_s20 = sadd.s32 4294967294, %s1572_s18   ;;  %s1572_s18 = sphi %s1625_s18, %s2071_s18   ;;  %s1568_s17 = sphi %s1623_s17, %s2070_s17   ;;  %s1564_s16 = sphi %s1621_s16, %s2069_s16   ;;  %s1560_s15 = sphi %s1619_s15, %s2068_s15  }
   0x4   : > { %s1644_s21 = sadd.s32 1, %s1572_s18   ;;  %s113_s22 = sadd.s32 1, %s1568_s17 }
   0x5   : > { %s110_s23 = ssub.s32 %s1572_s18, %s1644_s21  ;;  %p123_p0 = scmp.ne.s32.totalorder %s1568_s17, %s1564_s16 }
   0x6   : > { %p111_p1 = scmp.eq.s32.totalorder %s110_s23, 0  ;;  %p124_p2 = scmp.eq.s32.totalorder %s1640_s19, 1 }
   0x7   : > { %p129_p3 = scmp.ne.s32.totalorder %s1564_s16, %s1560_s15  ;;  %p130_p4 = scmp.eq.s32.totalorder %s1301_s20, 1 }
   0x8   : > { %s1655_s24 = scalar_select %p111_p1, %s1568_s17, %s113_s22  }
   0x9   : > { %p1657_p5 = por %p124_p2, %p123_p0  ;;  %p1661_p6 = por %p130_p4, %p129_p3 }
   0xa   : > { %p1304_p7 = scmp.ge.s32.totalorder %s1572_s18, 1  ;;  %p164_p8 = scmp.lt.s32.totalorder %s1572_s18, 3 }
   0xc   : > { %p165_p9 = pnand %p1304_p7, %p164_p8 }
   0xd   : > { %p189_p10 = scmp.lt.s32.totalorder (!%p165_p9), %s1640_s19, 1  ;;  %s1574_s14 = smov (!%p165_p9), 16  }
   0xe   : > { %168 = sbr.rel (%p165_p9) target bundleno = 2651 (0xa5b), region = 36  ;;  %s1576_s23 = smov (!%p165_p9), 113  }
   0xf   : > { %s1578_s10 = smov (!%p165_p9), 32   ;;  %s1579_s11 = smov (!%p165_p9), 114  }
  0x10   : > { %s1581_s12 = smov (!%p165_p9), 111   ;;  %s1582_s13 = smov (!%p165_p9), 110  }
  0x13   : > { %s190_s27 = scalar_select %p189_p10, %s1640_s19, 1  ;;  %vm250_vm0 = vcmask 1043456   ;;  %v1397_v3 = vld [vmem:[%s2058_s1] sm:$0xff]  ;;  %vm237_vm1 = vcmask 64512   ;;  %v1398_v4 = vld [vmem:[%s2058_s1 + $0x8] sm:$0xff]  ;;  %v1399_v5 = vld [vmem:[%s2058_s1 + $0x10] sm:$0xff]  ;;  %v196_v34 = vlaneseq }
  0x14   : > { %v1400_v6 = vld [vmem:[%s2058_s1 + $0x18] sm:$0xff]  ;;  %vm283_vm2 = vcmask 1047680   ;;  %v1701_v23 = vld [vmem:[%s2060_s3] sm:$0xff]  ;;  %v1575_v24 = vmov 0   ;;  %v1710_v29 = vld [vmem:[%s2060_s3 + $0x8] sm:$0xff]  ;;  %vm354_vm5 = vcmask 130048  }
  0x15   : > { %s1306_s28 = sshll.u32 %s190_s27, 3  ;;  %1470 = vset.pattern.permute.xlu1 %v1575_v24  ;;  %1471 = vset.pattern.permute.xlu2 %v1575_v24  ;;  %s1577_s27 = smov 127   ;;  %v1716_v35 = vand.u32 127, %v196_v34  ;;  %v1401_v59 = vld [vmem:[%s2059_s2] sm:$0xff]  ;;  %v1402_v60 = vld [vmem:[%s2059_s2 + $0x8] sm:$0xff]  ;;  %v1403_v61 = vld [vmem:[%s2059_s2 + $0x10] sm:$0xff] }
  0x16   : > { %s192_s5 = scalar_lea.vmem %s2057_s0, %s1306_s28  ;;  %vm412_vm6 = vcmask 1047808   ;;  %vm491_vm14 = vcmask 261120  }
  0x17   : > { %v194_v0 = vld [vmem:[%s192_s5] sm:$0xff]  ;;  %vm199_vm3 = vcmp.lt.s32.totalorder %v1716_v35, 15  ;;  %vm198_vm4 = vcmp.ge.s32.totalorder %v1716_v35, 1  ;;  %vm200_vm7 = vcmp.ge.s32.totalorder %v1716_v35, 2  ;;  %vm201_vm8 = vcmp.lt.s32.totalorder %v1716_v35, 16 }
  0x18   : > { %v195_v1 = vpack.c.bf16 %v194_v0, %v194_v0  ;;  %vm1783_vm9 = vmand %vm200_vm7, %vm201_vm8  ;;  %vm203_vm10 = vcmp.ge.s32.totalorder %v1716_v35, 17  ;;  %vm204_vm11 = vcmp.ge.s32.totalorder %v1716_v35, 16  ;;  %vm205_vm12 = vcmp.lt.s32.totalorder %v1716_v35, 30 }
  0x19   : > { %vm1798_vm13 = vmand %vm204_vm11, %vm205_vm12 }
  0x1a   : > { %v252_v2 = vsel %vm250_vm0, %v195_v1, 0 }
  0x1b   : > { %261 = vmatpush.bf16.msra.mxu0 %v252_v2 }
  0x1e   : > { %1323 = vmatmul.msk.bf16.vlgmr.msra.gmra.mxu0 %vm237_vm1, %v1397_v3 }
  0x2e   : > { %1324 = vmatmul.msk.bf16.gmra.mxu0 %vm237_vm1, %v1398_v4 }
  0x3e   : > { %1325 = vmatmul.msk.bf16.gmra.mxu0 %vm237_vm1, %v1399_v5 }
  0x4e   : > { %1326 = vmatmul.msk.bf16.gmra.mxu0 %vm237_vm1, %v1400_v6 }
  0x9b   : > { %v263_v7 = vpop.f32.mrf.mxu0 }
  0x9c   : > { %284 = vrot.lane.b32.xlu1 %v263_v7, %s1574_s14 }
  0xa3   : > { %v265_v8 = vpop.f32.mrf.mxu0 }
  0xa4   : > { %287 = vrot.lane.b32.xlu1 %v265_v8, %s1574_s14 }
  0xab   : > { %v1686_v9 = vpop.f32.mrf.mxu0 }
  0xb3   : > { %v270_v10 = vpop.f32.mrf.mxu0 }
  0xbb   : > { %v273_v11 = vpop.f32.mrf.mxu0 }
  0xc3   : > { %v275_v12 = vpop.f32.mrf.mxu0 }
  0xcb   : > { %v278_v13 = vpop.f32.mrf.mxu0 }
  0xcc   : > { %320 = vrot.lane.b32.xlu0 %v278_v13, %s1574_s14 }
  0xd3   : > { %v280_v14 = vpop.f32.mrf.mxu0 }
  0xd4   : > { %323 = vrot.lane.b32.xlu0 %v280_v14, %s1574_s14 }
 0x10e   : > { %v285_v15 = vpop.permute.xlu1 %284 }
 0x10f   : > { %v286_v16 = vsel %vm283_vm2, %v285_v15, %v263_v7 }
 0x110   : > { %290 = vrot.lane.b32.xlu0 %v286_v16, %s1574_s14  ;;  %v1580_v16 = vmov 1  }
 0x111   : > { %1473 = vset.pattern.permute.xlu0 %v1580_v16 }
 0x116   : > { %v288_v17 = vpop.permute.xlu1 %287 }
 0x117   : > { %v289_v18 = vsel %vm283_vm2, %v288_v17, %v265_v8 }
 0x118   : > { %292 = vrot.lane.b32.xlu1 %v289_v18, %s1574_s14 }
 0x120   : > { %310 = vperm.xlu1 %1470, %v1701_v23  }
 0x13e   : > { %v321_v19 = vpop.permute.xlu0 %320 }
 0x13f   : > { %v322_v20 = vsel %vm283_vm2, %v321_v19, %v278_v13 }
 0x140   : > { %326 = vrot.lane.b32.xlu2 %v322_v20, %s1574_s14 }
 0x146   : > { %v324_v21 = vpop.permute.xlu0 %323 }
 0x147   : > { %v325_v22 = vsel %vm283_vm2, %v324_v21, %v280_v14  ;;  %v1583_v21 = vmov 2  }
 0x148   : > { %328 = vrot.lane.b32.xlu2 %v325_v22, %s1574_s14  ;;  %1474 = vset.pattern.permute.xlu1 %v1583_v21  ;;  %v1584_v22 = vmov 3  }
 0x182   : > { %v291_v32 = vpop.permute.xlu0 %290 }
 0x183   : > { %v294_v33 = vsel %vm283_vm2, %v291_v32, %v263_v7 }
 0x18a   : > { %v293_v25 = vpop.permute.xlu1 %292 }
 0x18b   : > { %v295_v26 = vsel %vm283_vm2, %v293_v25, %v265_v8 }
 0x18c   : > { %300 = vrot.lane.b32.xlu1 %v295_v26, %s1576_s23 }
 0x192   : > { %v311_v39 = vpop.permute.xlu1 %310 }
 0x19a   : > { %v327_v27 = vpop.permute.xlu2 %326 }
 0x19b   : > { %v330_v28 = vsel %vm283_vm2, %v327_v27, %v278_v13 }
 0x19c   : > { %334 = vrot.lane.b32.xlu2 %v330_v28, %s1577_s27 }
 0x1a2   : > { %v329_v30 = vpop.permute.xlu2 %328 }
 0x1a3   : > { %v331_v31 = vsel %vm283_vm2, %v329_v30, %v280_v14 }
 0x1a4   : > { %336 = vrot.lane.b32.xlu0 %v331_v31, %s1577_s27  ;;  %315 = vperm.xlu2 %1471, %v1710_v29   ;;  %s1410_s27 = sshll.u32 %s1640_s19, 5 }
 0x1a5   : > { %s1235_s30 = scalar_lea.hbm %s2061_s4, %s1410_s27 }
 0x1a6   : > { %s1238_s6 = sshll.u32 %s1235_s30, 4  ;;  %s1239_s6 = int_to_ptr.hbm [resolvable:$true] %s1238_s6 }
 0x1a7   : > { %s1524_s8 = sshra.s32 %s1239_s6, 4  ;;  %s1525_s8 = int_to_ptr.hbm [resolvable:$true] %s1524_s8 }
 0x1a8   : > { %s1526_s9 = scalar_lea.hbm %s1525_s8, 32  ;;  %p1531_p0 = scmp.lt.s32.totalorder %s1525_s8, %s2061_s4 }
 0x1a9   : > { %p1527_p11 = scmp.ne.s32.totalorder %s1525_s8, %s1526_s9 }
 0x1ab   : > { %p1528_p12 = pnand %p1527_p11, %p1657_p5 }
 0x1ac   : > { %298 = vrot.lane.b32.xlu0 %v294_v33, %s1576_s23  ;;  %1472 = vset.pattern.permute.xlu2 %v1580_v16 }
 0x1ad   : > { %p1529_p13 = pneg %p1528_p12 }
 0x1f6   : > { %v335_v36 = vpop.permute.xlu2 %334 }
 0x1f7   : > { %v340_v37 = vsel %vm199_vm3, %v335_v36, 0.0 }
 0x1f8   : > { %v342_v38 = vadd.f32 %v340_v37, %v273_v11 }
 0x1fa   : > { %v344_v40 = vadd.f32 %v342_v38, %v311_v39 }
 0x1fc   : > { %348 = vrot.lane.b32.xlu2 %v344_v40, %s1574_s14 }
 0x1fe   : > { %v316_v44 = vpop.permute.xlu2 %315  ;;  %v301_v46 = vpop.permute.xlu1 %300 }
 0x1ff   : > { %v305_v48 = vsel %vm198_vm4, %v301_v46, 0.0 }
 0x200   : > { %v307_v50 = vadd.f32 %v305_v48, %v270_v10 }
 0x202   : > { %v319_v53 = vadd.f32 %v316_v44, %v307_v50 }
 0x216   : > { %v337_v41 = vpop.permute.xlu0 %336 }
 0x217   : > { %v341_v42 = vsel %vm199_vm3, %v337_v41, 0.0 }
 0x218   : > { %v343_v43 = vadd.f32 %v341_v42, %v275_v12 }
 0x21a   : > { %v345_v45 = vadd.f32 %v343_v43, %v316_v44 }
 0x21c   : > { %350 = vrot.lane.b32.xlu0 %v345_v45, %s1574_s14  ;;  %s1530_s14 = scalar_lea.hbm %s2061_s4, 64 }
 0x21d   : > { %p1532_p1 = scmp.lt.s32.totalorder %s1530_s14, %s1526_s9 }
 0x21e   : > { %v299_v47 = vpop.permute.xlu0 %298 }
 0x21f   : > { %v304_v49 = vsel %vm198_vm4, %v299_v47, 0.0  ;;  %p1533_p2 = por %p1532_p1, %p1531_p0 }
 0x220   : > { %v306_v51 = vadd.f32 %v304_v49, %v1686_v9 }
 0x221   : > { %p1534_p3 = pnand %p1533_p2, %p1529_p13 }
 0x222   : > { %v318_v54 = vadd.f32 %v311_v39, %v306_v51 }
 0x256   : > { %v349_v52 = vpop.permute.xlu2 %348 }
 0x257   : > { %v1728_v56 = vsel %vm354_vm5, %v318_v54, %v349_v52 }
 0x28e   : > { %v351_v55 = vpop.permute.xlu0 %350 }
 0x28f   : > { %v1731_v57 = vsel %vm354_vm5, %v319_v53, %v351_v55 }
 0x290   : > { %v363_v58 = vpack.c.bf16 %v1731_v57, %v1728_v56 }
 0x292   : > { %395 = vmatpush.bf16.msra.mxu1 %v363_v58 }
 0x295   : > { %1339 = vmatmul.msk.bf16.vlgmr.msra.gmra.mxu1 %vm354_vm5, %v1401_v59 }
 0x2a5   : > { %1340 = vmatmul.msk.bf16.gmra.mxu1 %vm354_vm5, %v1402_v60 }
 0x2b5   : > { %1341 = vmatmul.msk.bf16.gmra.mxu1 %vm354_vm5, %v1403_v61 }
 0x312   : > { %v397_v62 = vpop.f32.mrf.mxu1 }
 0x313   : > { %413 = vrot.lane.b32.xlu1 %v397_v62, %s1578_s10 }
 0x31a   : > { %v399_v63 = vpop.f32.mrf.mxu1 }
 0x31b   : > { %416 = vrot.lane.b32.xlu2 %v399_v63, %s1578_s10 }
 0x322   : > { %v1749_v0 = vpop.f32.mrf.mxu1 }
 0x32a   : > { %v1751_v1 = vpop.f32.mrf.mxu1 }
 0x332   : > { %v407_v2 = vpop.f32.mrf.mxu1 }
 0x333   : > { %447 = vrot.lane.b32.xlu0 %v407_v2, %s1578_s10 }
 0x33a   : > { %v409_v3 = vpop.f32.mrf.mxu1 }
 0x33b   : > { %450 = vrot.lane.b32.xlu1 %v409_v3, %s1578_s10 }
 0x375   : > { %v417_v4 = vpop.permute.xlu2 %416 }
 0x376   : > { %v418_v5 = vsel %vm412_vm6, %v417_v4, %v399_v63 }
 0x377   : > { %421 = vrot.lane.b32.xlu0 %v418_v5, %s1578_s10 }
 0x385   : > { %v414_v6 = vpop.permute.xlu1 %413 }
 0x386   : > { %v415_v7 = vsel %vm412_vm6, %v414_v6, %v397_v62 }
 0x387   : > { %419 = vrot.lane.b32.xlu2 %v415_v7, %s1578_s10 }
 0x3a5   : > { %v448_v8 = vpop.permute.xlu0 %447 }
 0x3a6   : > { %v449_v9 = vsel %vm412_vm6, %v448_v8, %v407_v2 }
 0x3a7   : > { %453 = vrot.lane.b32.xlu1 %v449_v9, %s1578_s10 }
 0x3ad   : > { %v451_v10 = vpop.permute.xlu1 %450 }
 0x3ae   : > { %v452_v11 = vsel %vm412_vm6, %v451_v10, %v409_v3 }
 0x3af   : > { %455 = vrot.lane.b32.xlu2 %v452_v11, %s1578_s10 }
 0x3e1   : > { %v420_v12 = vpop.permute.xlu2 %419 }
 0x3e2   : > { %v423_v13 = vsel %vm412_vm6, %v420_v12, %v397_v62 }
 0x3e3   : > { %427 = vrot.lane.b32.xlu0 %v423_v13, %s1579_s11  ;;  %435 = vrot.lane.b32.xlu2 %v423_v13, %s1576_s23 }
 0x3e9   : > { %v422_v14 = vpop.permute.xlu0 %421 }
 0x3ea   : > { %v424_v15 = vsel %vm412_vm6, %v422_v14, %v399_v63 }
 0x3eb   : > { %437 = vrot.lane.b32.xlu0 %v424_v15, %s1576_s23  ;;  %429 = vrot.lane.b32.xlu1 %v424_v15, %s1579_s11 }
 0x409   : > { %v456_v17 = vpop.permute.xlu2 %455 }
 0x40a   : > { %v458_v18 = vsel %vm412_vm6, %v456_v17, %v409_v3 }
 0x40b   : > { %463 = vrot.lane.b32.xlu2 %v458_v18, %s1581_s12 }
 0x413   : > { %482 = vperm.xlu2 %1472, %v1701_v23  }
 0x419   : > { %v454_v19 = vpop.permute.xlu1 %453 }
 0x41a   : > { %v457_v20 = vsel %vm412_vm6, %v454_v19, %v407_v2 }
 0x41b   : > { %471 = vrot.lane.b32.xlu0 %v457_v20, %s1582_s13  ;;  %461 = vrot.lane.b32.xlu1 %v457_v20, %s1581_s12 }
 0x41c   : > { %1475 = vset.pattern.permute.xlu2 %v1583_v21 }
 0x41d   : > { %537 = vperm.xlu2 %1475, %v1710_v29  }
 0x423   : > { %473 = vrot.lane.b32.xlu1 %v458_v18, %s1582_s13  ;;  %486 = vperm.xlu0 %1473, %v1710_v29  }
 0x425   : > { %1477 = vset.pattern.permute.xlu2 %v1584_v22 }
 0x426   : > { %547 = vperm.xlu2 %1477, %v1710_v29  }
 0x42b   : > { %533 = vperm.xlu1 %1474, %v1701_v23  }
 0x433   : > { %1476 = vset.pattern.permute.xlu1 %v1584_v22 }
 0x434   : > { %543 = vperm.xlu1 %1476, %v1701_v23  }
 0x43d   : > { %v436_v25 = vpop.permute.xlu2 %435 }
 0x43e   : > { %v441_v31 = vsel %vm203_vm10, %v436_v25, 0.0 }
 0x455   : > { %v428_v24 = vpop.permute.xlu0 %427 }
 0x456   : > { %v433_v30 = vsel %vm1783_vm9, %v428_v24, 0.0 }
 0x457   : > { %v443_v32 = vadd.f32 %v441_v31, %v433_v30 }
 0x459   : > { %v445_v39 = vadd.f32 %v443_v32, %v1749_v0 }
 0x45d   : > { %v438_v27 = vpop.permute.xlu0 %437  ;;  %v430_v28 = vpop.permute.xlu1 %429 }
 0x45e   : > { %v442_v34 = vsel %vm203_vm10, %v438_v27, 0.0  ;;  %v434_v36 = vsel %vm1783_vm9, %v430_v28, 0.0 }
 0x45f   : > { %v444_v42 = vadd.f32 %v442_v34, %v434_v36 }
 0x461   : > { %v446_v48 = vadd.f32 %v444_v42, %v1751_v1 }
 0x465   : > { %v464_v33 = vpop.permute.xlu2 %463 }
 0x466   : > { %v468_v46 = vsel %vm199_vm3, %v464_v33, 0.0 }
 0x467   : > { %v470_v49 = vadd.f32 %v468_v46, %v446_v48 }
 0x46d   : > { %v483_v47 = vpop.permute.xlu2 %482 }
 0x477   : > { %v538_v22 = vpop.permute.xlu2 %537 }
 0x48d   : > { %v472_v38 = vpop.permute.xlu0 %471  ;;  %v462_v40 = vpop.permute.xlu1 %461 }
 0x48e   : > { %v467_v41 = vsel %vm199_vm3, %v462_v40, 0.0  ;;  %v477_v44 = vsel %vm1798_vm13, %v472_v38, 0.0  ;;  %v548_v38 = vpop.permute.xlu2 %547 }
 0x48f   : > { %v469_v43 = vadd.f32 %v467_v41, %v445_v39 }
 0x491   : > { %v479_v45 = vadd.f32 %v477_v44, %v469_v43 }
 0x493   : > { %v489_v50 = vadd.f32 %v483_v47, %v479_v45 }
 0x495   : > { %v474_v51 = vpop.permute.xlu1 %473  ;;  %v487_v53 = vpop.permute.xlu0 %486  ;;  %v502_v55 = vmul.f32 %v489_v50, %v489_v50  ;;  %v492_v59 = vsel %vm491_vm14, %v489_v50, 0.0 }
 0x496   : > { %v478_v52 = vsel %vm1798_vm13, %v474_v51, 0.0 }
 0x497   : > { %v480_v54 = vadd.f32 %v478_v52, %v470_v49  ;;  %v504_v63 = vsel %vm491_vm14, %v502_v55, 0.0 }
 0x499   : > { %v490_v58 = vadd.f32 %v487_v53, %v480_v54 }
 0x49b   : > { %v493_v60 = vsel %vm491_vm14, %v490_v58, 0.0  ;;  %v503_v61 = vmul.f32 %v490_v58, %v490_v58 }
 0x49c   : > { %v494_v62 = vadd.f32 %v493_v60, %v492_v59 }
 0x49d   : > { %v505_v0 = vsel %vm491_vm14, %v503_v61, 0.0  ;;  %v534_v25 = vpop.permute.xlu1 %533 }
 0x49e   : > { %v495_v1 = vrot.slane %v494_v62, 4  ;;  %v506_v2 = vadd.f32 %v505_v0, %v504_v63 }
 0x4a0   : > { %v496_v3 = vadd.f32 %v495_v1, %v494_v62  ;;  %v507_v4 = vrot.slane %v506_v2, 4 }
 0x4a2   : > { %v497_v5 = vrot.slane %v496_v3, 2  ;;  %v508_v6 = vadd.f32 %v507_v4, %v506_v2 }
 0x4a4   : > { %v498_v7 = vadd.f32 %v497_v5, %v496_v3  ;;  %v509_v8 = vrot.slane %v508_v6, 2 }
 0x4a6   : > { %v510_v9 = vadd.f32 %v509_v8, %v508_v6  ;;  %v499_v10 = vrot.slane %v498_v7, 1  ;;  %v544_v39 = vpop.permute.xlu1 %543 }
 0x4a8   : > { %v511_v11 = vrot.slane %v510_v9, 1  ;;  %v500_v12 = vadd.f32 %v499_v10, %v498_v7 }
 0x4aa   : > { %v512_v13 = vadd.f32 %v511_v11, %v510_v9  ;;  %v501_v14 = vmul.f32 0.0625, %v500_v12 }
 0x4ac   : > { %v513_v15 = vmul.f32 0.0625, %v512_v13  ;;  %v514_v16 = vmul.f32 %v501_v14, %v501_v14  ;;  %v518_v31 = vsub.f32 %v490_v58, %v501_v14  ;;  %v517_v32 = vsub.f32 %v489_v50, %v501_v14 }
 0x4ae   : > { %v515_v17 = vsub.f32 %v513_v15, %v514_v16 }
 0x4b0   : > { %v516_v18 = vmax.f32 %v515_v17, 0.0 }
 0x4b2   : > { %v519_v19 = vadd.f32 1e-05, %v516_v18 }
 0x4b4   : > { %1490 = vrsqrt.f32 %v519_v19  ;;  %vm526_vm0 = vweird.f32 %v519_v19 }
 0x4ba   : > { %v1491_v20 = vpop.eup %1490 }
 0x4bb   : > { %v521_v21 = vmul.f32 %v1491_v20, %v519_v19  ;;  %vm527_vm15 = vweird.f32 %v1491_v20 }
 0x4bc   : > { %vm528_vm1 = vmor %vm526_vm0, %vm527_vm15 }
 0x4bd   : > { %v522_v24 = vmul.f32 %v1491_v20, %v521_v21 }
 0x4bf   : > { %v523_v27 = vmul.f32 0.5, %v522_v24 }
 0x4c1   : > { %v524_v28 = vsub.f32 1.5, %v523_v27 }
 0x4c3   : > { %v525_v30 = vmul.f32 %v1491_v20, %v524_v28 }
 0x4c5   : > { %v529_v33 = vsel %vm528_vm1, %v1491_v20, %v525_v30 }
 0x4c6   : > { %v531_v34 = vmul.f32 %v529_v33, %v518_v31  ;;  %v530_v36 = vmul.f32 %v529_v33, %v517_v32 }
 0x4c8   : > { %v541_v40 = vmul.f32 %v538_v22, %v531_v34  ;;  %v540_v41 = vmul.f32 %v534_v25, %v530_v36 }
 0x4ca   : > { %v1816_v42 = vadd.f32 %v548_v38, %v541_v40  ;;  %v1818_v43 = vadd.f32 %v544_v39, %v540_v41 }
 0x4cc   : > { %v1821_v44 = vmul.f32 0.70710677, %v1816_v42  ;;  %v1824_v45 = vmul.f32 0.70710677, %v1818_v43 }
 0x4ce   : > { %v596_v46 = vmul.f32 %v1821_v44, %v1821_v44  ;;  %v556_v47 = vmul.f32 %v1824_v45, %v1824_v45 }
 0x4d0   : > { %v597_v48 = vmin.f32 %v596_v46, 16.0  ;;  %v557_v49 = vmin.f32 %v556_v47, 16.0 }
 0x4d2   : > { %v598_v50 = vmul.f32 2.1237322e-06, %v597_v48  ;;  %v609_v51 = vmul.f32 3.8918573e-05, %v597_v48  ;;  %v558_v52 = vmul.f32 2.1237322e-06, %v557_v49 }
 0x4d3   : > { %v569_v53 = vmul.f32 3.8918573e-05, %v557_v49 }
 0x4d4   : > { %v599_v54 = vadd.f32 0.00028619796, %v598_v50  ;;  %v610_v55 = vadd.f32 0.001143296, %v609_v51  ;;  %v559_v58 = vadd.f32 0.00028619796, %v558_v52 }
 0x4d5   : > { %v570_v59 = vadd.f32 0.001143296, %v569_v53 }
 0x4d6   : > { %v600_v60 = vmul.f32 %v599_v54, %v597_v48  ;;  %v611_v61 = vmul.f32 %v610_v55, %v597_v48  ;;  %v560_v62 = vmul.f32 %v559_v58, %v557_v49 }
 0x4d7   : > { %v571_v63 = vmul.f32 %v570_v59, %v557_v49 }
 0x4d8   : > { %v601_v0 = vadd.f32 0.0036580483, %v600_v60  ;;  %v612_v1 = vadd.f32 0.014752088, %v611_v61  ;;  %v561_v4 = vadd.f32 0.0036580483, %v560_v62 }
 0x4d9   : > { %v572_v2 = vadd.f32 0.014752088, %v571_v63 }
 0x4da   : > { %v613_v3 = vmul.f32 %v612_v1, %v597_v48  ;;  %v602_v6 = vmul.f32 %v601_v0, %v597_v48  ;;  %v562_v10 = vmul.f32 %v561_v4, %v557_v49  ;;  %v553_v1 = vmul.f32 0.5, %v1816_v42  ;;  %v1405_v42 = vld [vmem:[%s2059_s2 + $0x20] sm:$0xff] }
 0x4db   : > { %v573_v5 = vmul.f32 %v572_v2, %v557_v49 }
 0x4dc   : > { %v614_v7 = vadd.f32 0.112945676, %v613_v3  ;;  %v603_v12 = vadd.f32 0.05243302, %v602_v6  ;;  %v563_v16 = vadd.f32 0.05243302, %v562_v10 }
 0x4dd   : > { %v574_v8 = vadd.f32 0.112945676, %v573_v5  ;;  %v552_v3 = vmul.f32 0.5, %v1818_v43 }
 0x4de   : > { %v615_v9 = vmul.f32 %v614_v7, %v597_v48  ;;  %v604_v18 = vmul.f32 %v603_v12, %v597_v48  ;;  %v564_v21 = vmul.f32 %v563_v16, %v557_v49 }
 0x4df   : > { %v575_v11 = vmul.f32 %v574_v8, %v557_v49  ;;  %v1404_v8 = vld [vmem:[%s2059_s2 + $0x18] sm:$0xff] }
 0x4e0   : > { %v616_v13 = vadd.f32 0.4994258, %v615_v9  ;;  %v605_v22 = vadd.f32 0.18741608, %v604_v18  ;;  %v565_v24 = vadd.f32 0.18741608, %v564_v21 }
 0x4e1   : > { %v576_v14 = vadd.f32 0.4994258, %v575_v11 }
 0x4e2   : > { %v617_v15 = vmul.f32 %v616_v13, %v597_v48  ;;  %v606_v27 = vmul.f32 %v605_v22, %v597_v48  ;;  %v566_v31 = vmul.f32 %v565_v24, %v557_v49 }
 0x4e3   : > { %v577_v17 = vmul.f32 %v576_v14, %v557_v49 }
 0x4e4   : > { %v618_v19 = vadd.f32 1.0, %v617_v15  ;;  %v607_v34 = vadd.f32 1.1283791, %v606_v27  ;;  %v567_v46 = vadd.f32 1.1283791, %v566_v31  ;;  %v1586_v31 = vmov 5  }
 0x4e5   : > { %v578_v20 = vadd.f32 1.0, %v577_v17  ;;  %1480 = vset.pattern.permute.xlu0 %v1586_v31 }
 0x4e6   : > { %1492 = vrcp.f32 %v618_v19  ;;  %v630_v36 = vand.u32 2147483648, %v618_v19  ;;  %v628_v40 = vand.u32 2147483647, %v618_v19  ;;  %vm624_vm7 = vweird.f32 %v618_v19 }
 0x4e7   : > { %1494 = vrcp.f32 %v578_v20  ;;  %v590_v41 = vand.u32 2147483648, %v578_v20  ;;  %v588_v50 = vand.u32 2147483647, %v578_v20  ;;  %vm584_vm11 = vweird.f32 %v578_v20 }
 0x4e8   : > { %v631_v48 = vor.u32 1.1754944e-38, %v630_v36  ;;  %v608_v49 = vmul.f32 %v607_v34, %v1821_v44  ;;  %vm629_vm12 = vcmp.eq.f32.partialorder %v628_v40, 8.507059e+37  ;;  %v568_v58 = vmul.f32 %v567_v46, %v1824_v45 }
 0x4e9   : > { %v591_v54 = vor.u32 1.1754944e-38, %v590_v41  ;;  %vm589_vm0 = vcmp.eq.f32.partialorder %v588_v50, 8.507059e+37  ;;  %v1587_v34 = vmov 6  }
 0x4ec   : > { %v1493_v25 = vpop.eup %1492 }
 0x4ed   : > { %v1495_v28 = vpop.eup %1494  ;;  %v620_v30 = vmul.f32 %v1493_v25, %v618_v19  ;;  %vm625_vm2 = vweird.f32 %v1493_v25 }
 0x4ee   : > { %v580_v32 = vmul.f32 %v1495_v28, %v578_v20  ;;  %vm585_vm4 = vweird.f32 %v1495_v28  ;;  %vm626_vm8 = vmor %vm624_vm7, %vm625_vm2 }
 0x4ef   : > { %v621_v33 = vsub.f32 1.0, %v620_v30  ;;  %vm586_vm15 = vmor %vm584_vm11, %vm585_vm4  ;;  %v1585_v30 = vmov 4  }
 0x4f0   : > { %v581_v38 = vsub.f32 1.0, %v580_v32  ;;  %1478 = vset.pattern.permute.xlu1 %v1585_v30  ;;  %1479 = vset.pattern.permute.xlu2 %v1585_v30 }
 0x4f1   : > { %v622_v39 = vmul.f32 %v1493_v25, %v621_v33 }
 0x4f2   : > { %v582_v47 = vmul.f32 %v1495_v28, %v581_v38 }
 0x4f3   : > { %v623_v51 = vadd.f32 %v1493_v25, %v622_v39 }
 0x4f4   : > { %v583_v52 = vadd.f32 %v1495_v28, %v582_v47 }
 0x4f5   : > { %v627_v53 = vsel %vm626_vm8, %v1493_v25, %v623_v51 }
 0x4f6   : > { %v632_v55 = vsel %vm629_vm12, %v631_v48, %v627_v53  ;;  %v587_v59 = vsel %vm586_vm15, %v1495_v28, %v583_v52 }
 0x4f7   : > { %v633_v60 = vmul.f32 %v632_v55, %v608_v49  ;;  %v592_v61 = vsel %vm589_vm0, %v591_v54, %v587_v59 }
 0x4f8   : > { %v593_v62 = vmul.f32 %v592_v61, %v568_v58 }
 0x4f9   : > { %v1343_v63 = vclamps-f32 %v633_v60, 1.0 }
 0x4fa   : > { %v1342_v0 = vclamps-f32 %v593_v62, 1.0 }
 0x4fb   : > { %v637_v2 = vadd.f32 1.0, %v1343_v63 }
 0x4fc   : > { %v636_v44 = vadd.f32 1.0, %v1342_v0 }
 0x4fd   : > { %v639_v4 = vmul.f32 %v637_v2, %v553_v1 }
 0x4fe   : > { %v638_v5 = vmul.f32 %v636_v44, %v552_v3 }
 0x4ff   : > { %v1835_v6 = vadd.f32 %v639_v4, %v1731_v57 }
 0x500   : > { %v1838_v45 = vadd.f32 %v638_v5, %v1728_v56  ;;  %v1406_v56 = vld [vmem:[%s2059_s2 + $0x28] sm:$0xff] }
 0x502   : > { %v649_v7 = vpack.c.bf16 %v1835_v6, %v1838_v45 }
 0x504   : > { %681 = vmatpush.bf16.msra.mxu2 %v649_v7 }
 0x507   : > { %1362 = vmatmul.msk.bf16.vlgmr.msra.gmra.mxu2 %vm354_vm5, %v1404_v8 }
 0x517   : > { %1363 = vmatmul.msk.bf16.gmra.mxu2 %vm354_vm5, %v1405_v42 }
 0x527   : > { %1364 = vmatmul.msk.bf16.gmra.mxu2 %vm354_vm5, %v1406_v56 }
 0x58a   : > { %v683_v57 = vpop.f32.mrf.mxu2 }
 0x58b   : > { %698 = vrot.lane.b32.xlu0 %v683_v57, %s1578_s10 }
 0x592   : > { %v685_v43 = vpop.f32.mrf.mxu2 }
 0x593   : > { %701 = vrot.lane.b32.xlu1 %v685_v43, %s1578_s10 }
 0x59a   : > { %v1856_v9 = vpop.f32.mrf.mxu2 }
 0x5a2   : > { %v690_v10 = vpop.f32.mrf.mxu2 }
 0x5aa   : > { %v693_v11 = vpop.f32.mrf.mxu2 }
 0x5ab   : > { %732 = vrot.lane.b32.xlu2 %v693_v11, %s1578_s10 }
 0x5b2   : > { %v695_v12 = vpop.f32.mrf.mxu2 }
 0x5b3   : > { %735 = vrot.lane.b32.xlu0 %v695_v12, %s1578_s10 }
 0x5fd   : > { %v699_v13 = vpop.permute.xlu0 %698 }
 0x5fe   : > { %v700_v14 = vsel %vm412_vm6, %v699_v13, %v683_v57 }
 0x5ff   : > { %704 = vrot.lane.b32.xlu1 %v700_v14, %s1578_s10 }
 0x605   : > { %v702_v15 = vpop.permute.xlu1 %701  ;;  %v733_v16 = vpop.permute.xlu2 %732 }
 0x606   : > { %v703_v17 = vsel %vm412_vm6, %v702_v15, %v685_v43  ;;  %v734_v18 = vsel %vm412_vm6, %v733_v16, %v693_v11 }
 0x607   : > { %706 = vrot.lane.b32.xlu2 %v703_v17, %s1578_s10  ;;  %738 = vrot.lane.b32.xlu0 %v734_v18, %s1578_s10 }
 0x625   : > { %v736_v19 = vpop.permute.xlu0 %735 }
 0x626   : > { %v737_v20 = vsel %vm412_vm6, %v736_v19, %v695_v12 }
 0x627   : > { %740 = vrot.lane.b32.xlu1 %v737_v20, %s1578_s10 }
 0x661   : > { %v707_v21 = vpop.permute.xlu2 %706 }
 0x662   : > { %v709_v22 = vsel %vm412_vm6, %v707_v21, %v685_v43 }
 0x663   : > { %714 = vrot.lane.b32.xlu0 %v709_v22, %s1579_s11 }
 0x671   : > { %v705_v24 = vpop.permute.xlu1 %704 }
 0x672   : > { %v708_v25 = vsel %vm412_vm6, %v705_v24, %v683_v57 }
 0x673   : > { %712 = vrot.lane.b32.xlu2 %v708_v25, %s1579_s11  ;;  %720 = vrot.lane.b32.xlu1 %v708_v25, %s1576_s23 }
 0x679   : > { %v739_v27 = vpop.permute.xlu0 %738 }
 0x67a   : > { %v742_v28 = vsel %vm412_vm6, %v739_v27, %v693_v11 }
 0x67b   : > { %722 = vrot.lane.b32.xlu2 %v709_v22, %s1576_s23  ;;  %746 = vrot.lane.b32.xlu0 %v742_v28, %s1581_s12 }
 0x683   : > { %756 = vrot.lane.b32.xlu2 %v742_v28, %s1582_s13 }
 0x68b   : > { %771 = vperm.xlu2 %1479, %v1710_v29  }
 0x693   : > { %1482 = vset.pattern.permute.xlu2 %v1587_v34 }
 0x694   : > { %827 = vperm.xlu2 %1482, %v1701_v23  }
 0x699   : > { %v741_v32 = vpop.permute.xlu1 %740 }
 0x69a   : > { %v743_v33 = vsel %vm412_vm6, %v741_v32, %v695_v12 }
 0x69b   : > { %748 = vrot.lane.b32.xlu1 %v743_v33, %s1581_s12  ;;  %758 = vrot.lane.b32.xlu0 %v743_v33, %s1582_s13 }
 0x6a3   : > { %767 = vperm.xlu1 %1478, %v1701_v23   ;;  %817 = vperm.xlu0 %1480, %v1701_v23  }
 0x6ab   : > { %1481 = vset.pattern.permute.xlu1 %v1586_v31 }
 0x6ac   : > { %821 = vperm.xlu1 %1481, %v1710_v29  }
 0x6b4   : > { %1483 = vset.pattern.permute.xlu1 %v1587_v34 }
 0x6b5   : > { %831 = vperm.xlu1 %1483, %v1710_v29  }
 0x6cd   : > { %v713_v36 = vpop.permute.xlu2 %712 }
 0x6ce   : > { %v718_v23 = vsel %vm1783_vm9, %v713_v36, 0.0 }
 0x6d5   : > { %v715_v38 = vpop.permute.xlu0 %714  ;;  %v723_v39 = vpop.permute.xlu2 %722 }
 0x6d6   : > { %v727_v46 = vsel %vm203_vm10, %v723_v39, 0.0  ;;  %v719_v47 = vsel %vm1783_vm9, %v715_v38, 0.0 }
 0x6d7   : > { %v729_v48 = vadd.f32 %v727_v46, %v719_v47 }
 0x6d9   : > { %v731_v53 = vadd.f32 %v729_v48, %v690_v10 }
 0x6dd   : > { %v757_v51 = vpop.permute.xlu2 %756 }
 0x6de   : > { %v762_v0 = vsel %vm1798_vm13, %v757_v51, 0.0 }
 0x6e5   : > { %v721_v40 = vpop.permute.xlu1 %720  ;;  %v772_v62 = vpop.permute.xlu2 %771 }
 0x6e6   : > { %v726_v50 = vsel %vm203_vm10, %v721_v40, 0.0 }
 0x6e7   : > { %v728_v29 = vadd.f32 %v726_v50, %v718_v23 }
 0x6e9   : > { %v730_v55 = vadd.f32 %v728_v29, %v1856_v9 }
 0x6ed   : > { %v747_v41 = vpop.permute.xlu0 %746 }
 0x6ee   : > { %v752_v52 = vsel %vm199_vm3, %v747_v41, 0.0  ;;  %v828_v23 = vpop.permute.xlu2 %827 }
 0x6ef   : > { %v754_v60 = vadd.f32 %v752_v52, %v730_v55 }
 0x6f1   : > { %v764_v2 = vadd.f32 %v762_v0, %v754_v60 }
 0x70d   : > { %v749_v49 = vpop.permute.xlu1 %748  ;;  %v759_v54 = vpop.permute.xlu0 %758 }
 0x70e   : > { %v753_v58 = vsel %vm199_vm3, %v749_v49, 0.0  ;;  %v763_v61 = vsel %vm1798_vm13, %v759_v54, 0.0 }
 0x70f   : > { %v755_v59 = vadd.f32 %v753_v58, %v731_v53 }
 0x711   : > { %v765_v63 = vadd.f32 %v763_v61, %v755_v59 }
 0x713   : > { %v775_v1 = vadd.f32 %v772_v62, %v765_v63 }
 0x715   : > { %v768_v3 = vpop.permute.xlu1 %767  ;;  %v787_v44 = vmul.f32 %v775_v1, %v775_v1  ;;  %v777_v5 = vsel %vm491_vm14, %v775_v1, 0.0  ;;  %v818_v46 = vpop.permute.xlu0 %817 }
 0x716   : > { %v774_v4 = vadd.f32 %v768_v3, %v764_v2 }
 0x717   : > { %v789_v56 = vsel %vm491_vm14, %v787_v44, 0.0 }
 0x718   : > { %v776_v7 = vsel %vm491_vm14, %v774_v4, 0.0  ;;  %v786_v8 = vmul.f32 %v774_v4, %v774_v4 }
 0x719   : > { %v778_v42 = vadd.f32 %v777_v5, %v776_v7 }
 0x71a   : > { %v788_v57 = vsel %vm491_vm14, %v786_v8, 0.0 }
 0x71b   : > { %v779_v43 = vrot.slane %v778_v42, 4  ;;  %v790_v9 = vadd.f32 %v789_v56, %v788_v57 }
 0x71d   : > { %v780_v10 = vadd.f32 %v779_v43, %v778_v42  ;;  %v791_v11 = vrot.slane %v790_v9, 4 }
 0x71e   : > { %v822_v32 = vpop.permute.xlu1 %821 }
 0x71f   : > { %v781_v12 = vrot.slane %v780_v10, 2  ;;  %v792_v13 = vadd.f32 %v791_v11, %v790_v9 }
 0x721   : > { %v782_v14 = vadd.f32 %v781_v12, %v780_v10  ;;  %v793_v15 = vrot.slane %v792_v13, 2 }
 0x723   : > { %v794_v16 = vadd.f32 %v793_v15, %v792_v13  ;;  %v783_v17 = vrot.slane %v782_v14, 1 }
 0x725   : > { %v795_v18 = vrot.slane %v794_v16, 1  ;;  %v784_v19 = vadd.f32 %v783_v17, %v782_v14 }
 0x727   : > { %v796_v20 = vadd.f32 %v795_v18, %v794_v16  ;;  %v785_v21 = vmul.f32 0.0625, %v784_v19  ;;  %v832_v51 = vpop.permute.xlu1 %831 }
 0x729   : > { %v797_v22 = vmul.f32 0.0625, %v796_v20  ;;  %v798_v24 = vmul.f32 %v785_v21, %v785_v21  ;;  %v802_v39 = vsub.f32 %v775_v1, %v785_v21  ;;  %v801_v40 = vsub.f32 %v774_v4, %v785_v21 }
 0x72b   : > { %v799_v25 = vsub.f32 %v797_v22, %v798_v24 }
 0x72d   : > { %v800_v27 = vmax.f32 %v799_v25, 0.0 }
 0x72f   : > { %v803_v28 = vadd.f32 1e-05, %v800_v27 }
 0x731   : > { %1496 = vrsqrt.f32 %v803_v28  ;;  %vm810_vm2 = vweird.f32 %v803_v28 }
 0x737   : > { %v1497_v30 = vpop.eup %1496 }
 0x738   : > { %v805_v31 = vmul.f32 %v1497_v30, %v803_v28  ;;  %vm811_vm1 = vweird.f32 %v1497_v30 }
 0x739   : > { %vm812_vm4 = vmor %vm810_vm2, %vm811_vm1 }
 0x73a   : > { %v806_v33 = vmul.f32 %v1497_v30, %v805_v31 }
 0x73c   : > { %v807_v34 = vmul.f32 0.5, %v806_v33 }
 0x73e   : > { %v808_v36 = vsub.f32 1.5, %v807_v34 }
 0x740   : > { %v809_v38 = vmul.f32 %v1497_v30, %v808_v36 }
 0x742   : > { %v813_v41 = vsel %vm812_vm4, %v1497_v30, %v809_v38 }
 0x743   : > { %v815_v47 = vmul.f32 %v813_v41, %v802_v39  ;;  %v814_v50 = vmul.f32 %v813_v41, %v801_v40 }
 0x745   : > { %v825_v48 = vmul.f32 %v822_v32, %v815_v47  ;;  %v824_v29 = vmul.f32 %v818_v46, %v814_v50 }
 0x747   : > { %v1907_v52 = vadd.f32 %v832_v51, %v825_v48  ;;  %v1909_v49 = vadd.f32 %v828_v23, %v824_v29 }
 0x749   : > { %v1912_v53 = vmul.f32 0.70710677, %v1907_v52  ;;  %v1915_v54 = vmul.f32 0.70710677, %v1909_v49 }
 0x74b   : > { %v880_v55 = vmul.f32 %v1912_v53, %v1912_v53  ;;  %v840_v58 = vmul.f32 %v1915_v54, %v1915_v54 }
 0x74d   : > { %v881_v59 = vmin.f32 %v880_v55, 16.0  ;;  %v841_v60 = vmin.f32 %v840_v58, 16.0 }
 0x74f   : > { %v882_v61 = vmul.f32 2.1237322e-06, %v881_v59  ;;  %v893_v62 = vmul.f32 3.8918573e-05, %v881_v59  ;;  %v842_v63 = vmul.f32 2.1237322e-06, %v841_v60 }
 0x750   : > { %v853_v0 = vmul.f32 3.8918573e-05, %v841_v60 }
 0x751   : > { %v883_v1 = vadd.f32 0.00028619796, %v882_v61  ;;  %v894_v2 = vadd.f32 0.001143296, %v893_v62  ;;  %v843_v3 = vadd.f32 0.00028619796, %v842_v63 }
 0x752   : > { %v854_v44 = vadd.f32 0.001143296, %v853_v0 }
 0x753   : > { %v884_v4 = vmul.f32 %v883_v1, %v881_v59  ;;  %v895_v5 = vmul.f32 %v894_v2, %v881_v59  ;;  %v844_v7 = vmul.f32 %v843_v3, %v841_v60 }
 0x754   : > { %v855_v8 = vmul.f32 %v854_v44, %v841_v60 }
 0x755   : > { %v885_v42 = vadd.f32 0.0036580483, %v884_v4  ;;  %v896_v56 = vadd.f32 0.014752088, %v895_v5  ;;  %v845_v9 = vadd.f32 0.0036580483, %v844_v7 }
 0x756   : > { %v856_v57 = vadd.f32 0.014752088, %v855_v8  ;;  %v837_v8 = vmul.f32 0.5, %v1907_v52  ;;  %v1408_v52 = vld [vmem:[%s2059_s2 + $0x38] sm:$0xff] }
 0x757   : > { %v897_v43 = vmul.f32 %v896_v56, %v881_v59  ;;  %v886_v11 = vmul.f32 %v885_v42, %v881_v59  ;;  %v846_v15 = vmul.f32 %v845_v9, %v841_v60  ;;  %v836_v56 = vmul.f32 0.5, %v1909_v49 }
 0x758   : > { %v857_v10 = vmul.f32 %v856_v57, %v841_v60 }
 0x759   : > { %v898_v12 = vadd.f32 0.112945676, %v897_v43  ;;  %v887_v17 = vadd.f32 0.05243302, %v886_v11  ;;  %v847_v21 = vadd.f32 0.05243302, %v846_v15 }
 0x75a   : > { %v858_v13 = vadd.f32 0.112945676, %v857_v10  ;;  %v1407_v11 = vld [vmem:[%s2059_s2 + $0x30] sm:$0xff] }
 0x75b   : > { %v899_v14 = vmul.f32 %v898_v12, %v881_v59  ;;  %v888_v24 = vmul.f32 %v887_v17, %v881_v59  ;;  %v848_v28 = vmul.f32 %v847_v21, %v841_v60 }
 0x75c   : > { %v859_v16 = vmul.f32 %v858_v13, %v841_v60 }
 0x75d   : > { %v900_v18 = vadd.f32 0.4994258, %v899_v14  ;;  %v889_v30 = vadd.f32 0.18741608, %v888_v24  ;;  %v849_v31 = vadd.f32 0.18741608, %v848_v28 }
 0x75e   : > { %v860_v19 = vadd.f32 0.4994258, %v859_v16  ;;  %v1588_v28 = vmov 7  }
 0x75f   : > { %v901_v20 = vmul.f32 %v900_v18, %v881_v59  ;;  %v890_v33 = vmul.f32 %v889_v30, %v881_v59  ;;  %v850_v38 = vmul.f32 %v849_v31, %v841_v60  ;;  %1485 = vset.pattern.permute.xlu1 %v1588_v28  ;;  %1484 = vset.pattern.permute.xlu0 %v1588_v28  ;;  %v1589_v30 = vmov 8  }
 0x760   : > { %v861_v22 = vmul.f32 %v860_v19, %v841_v60  ;;  %1486 = vset.pattern.permute.xlu2 %v1589_v30 }
 0x761   : > { %v902_v25 = vadd.f32 1.0, %v901_v20  ;;  %v891_v41 = vadd.f32 1.1283791, %v890_v33  ;;  %v851_v48 = vadd.f32 1.1283791, %v850_v38 }
 0x762   : > { %v862_v27 = vadd.f32 1.0, %v861_v22 }
 0x763   : > { %1498 = vrcp.f32 %v902_v25  ;;  %v914_v46 = vand.u32 2147483648, %v902_v25  ;;  %v912_v51 = vand.u32 2147483647, %v902_v25  ;;  %vm908_vm11 = vweird.f32 %v902_v25 }
 0x764   : > { %1500 = vrcp.f32 %v862_v27  ;;  %v874_v23 = vand.u32 2147483648, %v862_v27  ;;  %v872_v55 = vand.u32 2147483647, %v862_v27  ;;  %vm868_vm15 = vweird.f32 %v862_v27 }
 0x765   : > { %v915_v59 = vor.u32 1.1754944e-38, %v914_v46  ;;  %v892_v60 = vmul.f32 %v891_v41, %v1912_v53  ;;  %vm913_vm0 = vcmp.eq.f32.partialorder %v912_v51, 8.507059e+37  ;;  %v852_v1 = vmul.f32 %v851_v48, %v1915_v54 }
 0x766   : > { %v875_v63 = vor.u32 1.1754944e-38, %v874_v23  ;;  %vm873_vm2 = vcmp.eq.f32.partialorder %v872_v55, 8.507059e+37  ;;  %v1590_v41 = vmov 9  }
 0x769   : > { %v1499_v32 = vpop.eup %1498 }
 0x76a   : > { %v1501_v34 = vpop.eup %1500  ;;  %v904_v36 = vmul.f32 %v1499_v32, %v902_v25  ;;  %vm909_vm7 = vweird.f32 %v1499_v32 }
 0x76b   : > { %v864_v39 = vmul.f32 %v1501_v34, %v862_v27  ;;  %vm869_vm8 = vweird.f32 %v1501_v34  ;;  %vm910_vm12 = vmor %vm908_vm11, %vm909_vm7 }
 0x76c   : > { %v905_v40 = vsub.f32 1.0, %v904_v36  ;;  %vm870_vm1 = vmor %vm868_vm15, %vm869_vm8 }
 0x76d   : > { %v865_v47 = vsub.f32 1.0, %v864_v39  ;;  %v1508_v39 = vld [vmem:[%s2060_s3] sm:$0xff] }
 0x76e   : > { %v906_v50 = vmul.f32 %v1499_v32, %v905_v40  ;;  %v1509_v40 = vld [vmem:[%s2060_s3 + $0x8] sm:$0xff] }
 0x76f   : > { %v866_v29 = vmul.f32 %v1501_v34, %v865_v47 }
 0x770   : > { %v907_v58 = vadd.f32 %v1499_v32, %v906_v50 }
 0x771   : > { %v867_v61 = vadd.f32 %v1501_v34, %v866_v29 }
 0x772   : > { %v911_v62 = vsel %vm910_vm12, %v1499_v32, %v907_v58 }
 0x773   : > { %v916_v0 = vsel %vm913_vm0, %v915_v59, %v911_v62  ;;  %v871_v2 = vsel %vm870_vm1, %v1501_v34, %v867_v61 }
 0x774   : > { %v917_v3 = vmul.f32 %v916_v0, %v892_v60  ;;  %v876_v44 = vsel %vm873_vm2, %v875_v63, %v871_v2 }
 0x775   : > { %v877_v4 = vmul.f32 %v876_v44, %v852_v1 }
 0x776   : > { %v1366_v5 = vclamps-f32 %v917_v3, 1.0 }
 0x777   : > { %v1365_v7 = vclamps-f32 %v877_v4, 1.0 }
 0x778   : > { %v921_v42 = vadd.f32 1.0, %v1366_v5 }
 0x779   : > { %v920_v53 = vadd.f32 1.0, %v1365_v7 }
 0x77a   : > { %v923_v57 = vmul.f32 %v921_v42, %v837_v8 }
 0x77b   : > { %v922_v43 = vmul.f32 %v920_v53, %v836_v56 }
 0x77c   : > { %v1926_v9 = vadd.f32 %v923_v57, %v1835_v6  ;;  %v1409_v6 = vld [vmem:[%s2059_s2 + $0x40] sm:$0xff] }
 0x77d   : > { %v1929_v54 = vadd.f32 %v922_v43, %v1838_v45 }
 0x77f   : > { %v933_v10 = vpack.c.bf16 %v1926_v9, %v1929_v54 }
 0x781   : > { %965 = vmatpush.bf16.msra.mxu3 %v933_v10 }
 0x784   : > { %1385 = vmatmul.msk.bf16.vlgmr.msra.gmra.mxu3 %vm354_vm5, %v1407_v11 }
 0x794   : > { %1386 = vmatmul.msk.bf16.gmra.mxu3 %vm354_vm5, %v1408_v52 }
 0x7a4   : > { %1387 = vmatmul.msk.bf16.gmra.mxu3 %vm354_vm5, %v1409_v6 }
 0x807   : > { %v967_v45 = vpop.f32.mrf.mxu3 }
 0x808   : > { %982 = vrot.lane.b32.xlu2 %v967_v45, %s1578_s10 }
 0x80f   : > { %v969_v49 = vpop.f32.mrf.mxu3 }
 0x810   : > { %985 = vrot.lane.b32.xlu0 %v969_v49, %s1578_s10 }
 0x817   : > { %v1947_v12 = vpop.f32.mrf.mxu3 }
 0x81f   : > { %v1949_v13 = vpop.f32.mrf.mxu3 }
 0x827   : > { %v977_v14 = vpop.f32.mrf.mxu3 }
 0x828   : > { %1016 = vrot.lane.b32.xlu1 %v977_v14, %s1578_s10 }
 0x82f   : > { %v979_v15 = vpop.f32.mrf.mxu3 }
 0x830   : > { %1019 = vrot.lane.b32.xlu2 %v979_v15, %s1578_s10 }
 0x862   : > { %v983_v16 = vpop.permute.xlu2 %982 }
 0x863   : > { %v984_v17 = vsel %vm412_vm6, %v983_v16, %v967_v45 }
 0x864   : > { %988 = vrot.lane.b32.xlu0 %v984_v17, %s1578_s10 }
 0x882   : > { %v986_v18 = vpop.permute.xlu0 %985 }
 0x883   : > { %v987_v19 = vsel %vm412_vm6, %v986_v18, %v969_v49 }
 0x884   : > { %990 = vrot.lane.b32.xlu1 %v987_v19, %s1578_s10 }
 0x88a   : > { %v1020_v20 = vpop.permute.xlu2 %1019 }
 0x88b   : > { %v1021_v21 = vsel %vm412_vm6, %v1020_v20, %v979_v15 }
 0x88c   : > { %1024 = vrot.lane.b32.xlu0 %v1021_v21, %s1578_s10 }
 0x89a   : > { %v1017_v22 = vpop.permute.xlu1 %1016 }
 0x89b   : > { %v1018_v24 = vsel %vm412_vm6, %v1017_v22, %v977_v14 }
 0x89c   : > { %1022 = vrot.lane.b32.xlu2 %v1018_v24, %s1578_s10 }
 0x8d6   : > { %v989_v25 = vpop.permute.xlu0 %988 }
 0x8d7   : > { %v992_v27 = vsel %vm412_vm6, %v989_v25, %v967_v45 }
 0x8d8   : > { %996 = vrot.lane.b32.xlu1 %v992_v27, %s1579_s11  ;;  %1004 = vrot.lane.b32.xlu0 %v992_v27, %s1576_s23 }
 0x8f6   : > { %v991_v31 = vpop.permute.xlu1 %990  ;;  %v1023_v33 = vpop.permute.xlu2 %1022 }
 0x8f7   : > { %v993_v32 = vsel %vm412_vm6, %v991_v31, %v969_v49  ;;  %v1026_v38 = vsel %vm412_vm6, %v1023_v33, %v977_v14 }
 0x8f8   : > { %1006 = vrot.lane.b32.xlu1 %v993_v32, %s1576_s23  ;;  %998 = vrot.lane.b32.xlu2 %v993_v32, %s1579_s11  ;;  %s186_s11 = sand.u32 1, %s1564_s16  }
 0x8f9   : > { %s1224_s7 = scalar_lea.sflag [#allocation3], %s186_s11 }
 0x8fe   : > { %v1025_v34 = vpop.permute.xlu0 %1024 }
 0x8ff   : > { %v1027_v36 = vsel %vm412_vm6, %v1025_v34, %v979_v15 }
 0x900   : > { %1032 = vrot.lane.b32.xlu0 %v1027_v36, %s1581_s12  ;;  %1040 = vrot.lane.b32.xlu1 %v1026_v38, %s1582_s13 }
 0x901   : > { %1030 = vrot.lane.b32.xlu2 %v1026_v38, %s1581_s12  ;;  %s1305_s12 = sshll.u32 %s186_s11, 5 }
 0x902   : > { %s188_s22 = scalar_lea.vmem [#allocation2], %s1305_s12 }
 0x903   : > { %s1236_s5 = sshll.u32 %s188_s22, 4  ;;  %s1237_s5 = int_to_ptr.vmem [resolvable:$true] %s1236_s5 }
 0x908   : > { %1051 = vperm.xlu0 %1484, %v1508_v39   ;;  %1055 = vperm.xlu1 %1485, %v1509_v40  }
 0x909   : > { %1042 = vrot.lane.b32.xlu2 %v1027_v36, %s1582_s13  ;;  %s1591_s13 = smov 112  }
 0x910   : > { %1487 = vset.pattern.permute.xlu1 %v1589_v30  ;;  %1489 = vset.pattern.permute.xlu0 %v1590_v41 }
 0x911   : > { %1105 = vperm.xlu1 %1487, %v1509_v40   ;;  %1115 = vperm.xlu0 %1489, %v1509_v40  }
 0x912   : > { %1101 = vperm.xlu2 %1486, %v1508_v39  }
 0x91a   : > { %1488 = vset.pattern.permute.xlu2 %v1590_v41 }
 0x91b   : > { %1111 = vperm.xlu2 %1488, %v1508_v39  }
 0x94a   : > { %v997_v47 = vpop.permute.xlu1 %996  ;;  %v1005_v50 = vpop.permute.xlu0 %1004 }
 0x94b   : > { %v1002_v29 = vsel %vm1783_vm9, %v997_v47, 0.0  ;;  %v1010_v55 = vsel %vm203_vm10, %v1005_v50, 0.0 }
 0x94c   : > { %v1012_v61 = vadd.f32 %v1010_v55, %v1002_v29 }
 0x94e   : > { %v1014_v2 = vadd.f32 %v1012_v61, %v1947_v12 }
 0x952   : > { %v999_v46 = vpop.permute.xlu2 %998 }
 0x953   : > { %v1003_v58 = vsel %vm1783_vm9, %v999_v46, 0.0 }
 0x95b   : > { %v1031_v23 = vpop.permute.xlu2 %1030 }
 0x95c   : > { %v1036_v1 = vsel %vm199_vm3, %v1031_v23, 0.0 }
 0x95d   : > { %v1038_v4 = vadd.f32 %v1036_v1, %v1014_v2 }
 0x963   : > { %v1043_v3 = vpop.permute.xlu2 %1042 }
 0x964   : > { %v1047_v5 = vsel %vm1798_vm13, %v1043_v3, 0.0 }
 0x96a   : > { %v1007_v51 = vpop.permute.xlu1 %1006 }
 0x96b   : > { %v1011_v48 = vsel %vm203_vm10, %v1007_v51, 0.0 }
 0x96c   : > { %v1013_v59 = vadd.f32 %v1011_v48, %v1003_v58  ;;  %v1102_v36 = vpop.permute.xlu2 %1101 }
 0x96e   : > { %v1015_v63 = vadd.f32 %v1013_v59, %v1949_v13 }
 0x972   : > { %v1033_v60 = vpop.permute.xlu0 %1032  ;;  %v1041_v62 = vpop.permute.xlu1 %1040 }
 0x973   : > { %v1037_v0 = vsel %vm199_vm3, %v1033_v60, 0.0  ;;  %v1046_v26 = vsel %vm1798_vm13, %v1041_v62, 0.0 }
 0x974   : > { %v1039_v44 = vadd.f32 %v1037_v0, %v1015_v63  ;;  %v1048_v7 = vadd.f32 %v1046_v26, %v1038_v4 }
 0x975   : > { %v1112_v29 = vpop.permute.xlu2 %1111 }
 0x976   : > { %v1049_v8 = vadd.f32 %v1047_v5, %v1039_v44 }
 0x97a   : > { %v1052_v42 = vpop.permute.xlu0 %1051  ;;  %v1056_v56 = vpop.permute.xlu1 %1055 }
 0x97b   : > { %v1058_v53 = vadd.f32 %v1052_v42, %v1048_v7  ;;  %v1059_v57 = vadd.f32 %v1056_v56, %v1049_v8 }
 0x97d   : > { %v1060_v35 = vsel %vm491_vm14, %v1058_v53, 0.0  ;;  %v1070_v43 = vmul.f32 %v1058_v53, %v1058_v53  ;;  %v1061_v10 = vsel %vm491_vm14, %v1059_v57, 0.0  ;;  %v1071_v11 = vmul.f32 %v1059_v57, %v1059_v57 }
 0x97e   : > { %v1062_v52 = vadd.f32 %v1061_v10, %v1060_v35 }
 0x97f   : > { %v1072_v6 = vsel %vm491_vm14, %v1070_v43, 0.0  ;;  %v1073_v45 = vsel %vm491_vm14, %v1071_v11, 0.0 }
 0x980   : > { %v1063_v49 = vrot.slane %v1062_v52, 4  ;;  %v1074_v37 = vadd.f32 %v1073_v45, %v1072_v6 }
 0x982   : > { %v1064_v12 = vadd.f32 %v1063_v49, %v1062_v52  ;;  %v1075_v13 = vrot.slane %v1074_v37, 4 }
 0x983   : > { %v1106_v50 = vpop.permute.xlu1 %1105  ;;  %v1116_v48 = vpop.permute.xlu0 %1115 }
 0x984   : > { %v1065_v14 = vrot.slane %v1064_v12, 2  ;;  %v1076_v15 = vadd.f32 %v1075_v13, %v1074_v37 }
 0x986   : > { %v1066_v16 = vadd.f32 %v1065_v14, %v1064_v12  ;;  %v1077_v17 = vrot.slane %v1076_v15, 2 }
 0x988   : > { %v1078_v18 = vadd.f32 %v1077_v17, %v1076_v15  ;;  %v1067_v19 = vrot.slane %v1066_v16, 1 }
 0x98a   : > { %v1079_v20 = vrot.slane %v1078_v18, 1  ;;  %v1068_v21 = vadd.f32 %v1067_v19, %v1066_v16 }
 0x98c   : > { %v1080_v22 = vadd.f32 %v1079_v20, %v1078_v18  ;;  %v1069_v24 = vmul.f32 0.0625, %v1068_v21 }
 0x98e   : > { %v1081_v25 = vmul.f32 0.0625, %v1080_v22  ;;  %v1082_v27 = vmul.f32 %v1069_v24, %v1069_v24  ;;  %v1085_v41 = vsub.f32 %v1058_v53, %v1069_v24  ;;  %v1086_v46 = vsub.f32 %v1059_v57, %v1069_v24 }
 0x990   : > { %v1083_v28 = vsub.f32 %v1081_v25, %v1082_v27 }
 0x992   : > { %v1084_v30 = vmax.f32 %v1083_v28, 0.0 }
 0x994   : > { %v1087_v31 = vadd.f32 1e-05, %v1084_v30 }
 0x996   : > { %1502 = vrsqrt.f32 %v1087_v31  ;;  %vm1094_vm6 = vweird.f32 %v1087_v31 }
 0x99c   : > { %v1503_v32 = vpop.eup %1502 }
 0x99d   : > { %v1089_v33 = vmul.f32 %v1503_v32, %v1087_v31  ;;  %vm1095_vm3 = vweird.f32 %v1503_v32 }
 0x99e   : > { %vm1096_vm9 = vmor %vm1094_vm6, %vm1095_vm3 }
 0x99f   : > { %v1090_v34 = vmul.f32 %v1503_v32, %v1089_v33 }
 0x9a1   : > { %v1091_v38 = vmul.f32 0.5, %v1090_v34 }
 0x9a3   : > { %v1092_v39 = vsub.f32 1.5, %v1091_v38 }
 0x9a5   : > { %v1093_v40 = vmul.f32 %v1503_v32, %v1092_v39 }
 0x9a7   : > { %v1097_v47 = vsel %vm1096_vm9, %v1503_v32, %v1093_v40 }
 0x9a8   : > { %v1098_v51 = vmul.f32 %v1097_v47, %v1085_v41  ;;  %v1099_v23 = vmul.f32 %v1097_v47, %v1086_v46 }
 0x9aa   : > { %v1108_v55 = vmul.f32 %v1102_v36, %v1098_v51  ;;  %v1109_v58 = vmul.f32 %v1106_v50, %v1099_v23 }
 0x9ac   : > { %v2001_v59 = vadd.f32 %v1116_v48, %v1109_v58  ;;  %v2003_v61 = vadd.f32 %v1112_v29, %v1108_v55 }
 0x9ae   : > { %v2006_v60 = vmul.f32 0.70710677, %v2001_v59  ;;  %v2009_v62 = vmul.f32 0.70710677, %v2003_v61 }
 0x9b0   : > { %v1164_v63 = vmul.f32 %v2006_v60, %v2006_v60  ;;  %v1124_v0 = vmul.f32 %v2009_v62, %v2009_v62 }
 0x9b2   : > { %v1165_v1 = vmin.f32 %v1164_v63, 16.0  ;;  %v1125_v2 = vmin.f32 %v1124_v0, 16.0 }
 0x9b4   : > { %v1166_v3 = vmul.f32 2.1237322e-06, %v1165_v1  ;;  %v1177_v44 = vmul.f32 3.8918573e-05, %v1165_v1  ;;  %v1126_v26 = vmul.f32 2.1237322e-06, %v1125_v2 }
 0x9b5   : > { %v1137_v4 = vmul.f32 3.8918573e-05, %v1125_v2 }
 0x9b6   : > { %v1167_v5 = vadd.f32 0.00028619796, %v1166_v3  ;;  %v1178_v7 = vadd.f32 0.001143296, %v1177_v44  ;;  %v1127_v8 = vadd.f32 0.00028619796, %v1126_v26 }
 0x9b7   : > { %v1138_v42 = vadd.f32 0.001143296, %v1137_v4 }
 0x9b8   : > { %v1168_v56 = vmul.f32 %v1167_v5, %v1165_v1  ;;  %v1179_v53 = vmul.f32 %v1178_v7, %v1165_v1  ;;  %v1128_v57 = vmul.f32 %v1127_v8, %v1125_v2 }
 0x9b9   : > { %v1139_v35 = vmul.f32 %v1138_v42, %v1125_v2 }
 0x9ba   : > { %v1169_v43 = vadd.f32 0.0036580483, %v1168_v56  ;;  %v1180_v10 = vadd.f32 0.014752088, %v1179_v53  ;;  %v1129_v6 = vadd.f32 0.0036580483, %v1128_v57 }
 0x9bb   : > { %v1140_v11 = vadd.f32 0.014752088, %v1139_v35  ;;  %v1121_v56 = vmul.f32 0.5, %v2001_v59 }
 0x9bc   : > { %v1181_v52 = vmul.f32 %v1180_v10, %v1165_v1  ;;  %v1170_v49 = vmul.f32 %v1169_v43, %v1165_v1  ;;  %v1130_v14 = vmul.f32 %v1129_v6, %v1125_v2 }
 0x9bd   : > { %v1141_v45 = vmul.f32 %v1140_v11, %v1125_v2 }
 0x9be   : > { %v1182_v37 = vadd.f32 0.112945676, %v1181_v52  ;;  %v1171_v16 = vadd.f32 0.05243302, %v1170_v49  ;;  %v1131_v20 = vadd.f32 0.05243302, %v1130_v14 }
 0x9bf   : > { %v1142_v12 = vadd.f32 0.112945676, %v1141_v45 }
 0x9c0   : > { %v1183_v13 = vmul.f32 %v1182_v37, %v1165_v1  ;;  %v1172_v22 = vmul.f32 %v1171_v16, %v1165_v1  ;;  %v1132_v27 = vmul.f32 %v1131_v20, %v1125_v2 }
 0x9c1   : > { %v1143_v15 = vmul.f32 %v1142_v12, %v1125_v2 }
 0x9c2   : > { %v1184_v17 = vadd.f32 0.4994258, %v1183_v13  ;;  %v1173_v28 = vadd.f32 0.18741608, %v1172_v22  ;;  %v1133_v30 = vadd.f32 0.18741608, %v1132_v27 }
 0x9c3   : > { %v1144_v18 = vadd.f32 0.4994258, %v1143_v15 }
 0x9c4   : > { %v1185_v19 = vmul.f32 %v1184_v17, %v1165_v1  ;;  %v1174_v32 = vmul.f32 %v1173_v28, %v1165_v1  ;;  %v1134_v36 = vmul.f32 %v1133_v30, %v1125_v2 }
 0x9c5   : > { %v1145_v21 = vmul.f32 %v1144_v18, %v1125_v2 }
 0x9c6   : > { %v1186_v24 = vadd.f32 1.0, %v1185_v19  ;;  %v1175_v40 = vadd.f32 1.1283791, %v1174_v32  ;;  %v1135_v23 = vadd.f32 1.1283791, %v1134_v36 }
 0x9c7   : > { %v1146_v25 = vadd.f32 1.0, %v1145_v21 }
 0x9c8   : > { %1504 = vrcp.f32 %v1186_v24  ;;  %v1198_v41 = vand.u32 2147483648, %v1186_v24  ;;  %v1196_v50 = vand.u32 2147483647, %v1186_v24  ;;  %vm1192_vm14 = vweird.f32 %v1186_v24 }
 0x9c9   : > { %1506 = vrcp.f32 %v1146_v25  ;;  %v1158_v51 = vand.u32 2147483648, %v1146_v25  ;;  %v1156_v29 = vand.u32 2147483647, %v1146_v25  ;;  %vm1152_vm7 = vweird.f32 %v1146_v25 }
 0x9ca   : > { %v1199_v58 = vor.u32 1.1754944e-38, %v1198_v41  ;;  %v1176_v0 = vmul.f32 %v1175_v40, %v2006_v60  ;;  %vm1197_vm8 = vcmp.eq.f32.partialorder %v1196_v50, 8.507059e+37  ;;  %v1136_v44 = vmul.f32 %v1135_v23, %v2009_v62 }
 0x9cb   : > { %v1159_v2 = vor.u32 1.1754944e-38, %v1158_v51  ;;  %vm1157_vm12 = vcmp.eq.f32.partialorder %v1156_v29, 8.507059e+37  ;;  %v1120_v60 = vmul.f32 0.5, %v2003_v61 }
 0x9ce   : > { %v1505_v31 = vpop.eup %1504 }
 0x9cf   : > { %v1507_v33 = vpop.eup %1506  ;;  %v1188_v34 = vmul.f32 %v1505_v31, %v1186_v24  ;;  %vm1193_vm10 = vweird.f32 %v1505_v31 }
 0x9d0   : > { %v1148_v38 = vmul.f32 %v1507_v33, %v1146_v25  ;;  %vm1153_vm13 = vweird.f32 %v1507_v33  ;;  %vm1194_vm4 = vmor %vm1192_vm14, %vm1193_vm10 }
 0x9d1   : > { %v1189_v39 = vsub.f32 1.0, %v1188_v34  ;;  %vm1154_vm11 = vmor %vm1152_vm7, %vm1153_vm13 }
 0x9d2   : > { %v1149_v46 = vsub.f32 1.0, %v1148_v38 }
 0x9d3   : > { %v1190_v47 = vmul.f32 %v1505_v31, %v1189_v39 }
 0x9d4   : > { %v1150_v48 = vmul.f32 %v1507_v33, %v1149_v46 }
 0x9d5   : > { %v1191_v55 = vadd.f32 %v1505_v31, %v1190_v47 }
 0x9d6   : > { %v1151_v63 = vadd.f32 %v1507_v33, %v1150_v48 }
 0x9d7   : > { %v1195_v1 = vsel %vm1194_vm4, %v1505_v31, %v1191_v55 }
 0x9d8   : > { %v1200_v3 = vsel %vm1197_vm8, %v1199_v58, %v1195_v1  ;;  %v1155_v26 = vsel %vm1154_vm11, %v1507_v33, %v1151_v63 }
 0x9d9   : > { %v1201_v4 = vmul.f32 %v1200_v3, %v1176_v0  ;;  %v1160_v5 = vsel %vm1157_vm12, %v1159_v2, %v1155_v26 }
 0x9da   : > { %v1161_v7 = vmul.f32 %v1160_v5, %v1136_v44 }
 0x9db   : > { %v1389_v8 = vclamps-f32 %v1201_v4, 1.0 }
 0x9dc   : > { %v1388_v42 = vclamps-f32 %v1161_v7, 1.0 }
 0x9dd   : > { %v1205_v53 = vadd.f32 1.0, %v1389_v8 }
 0x9de   : > { %v1204_v57 = vadd.f32 1.0, %v1388_v42 }
 0x9df   : > { %v1207_v35 = vmul.f32 %v1205_v53, %v1121_v56 }
 0x9e0   : > { %v1206_v43 = vmul.f32 %v1204_v57, %v1120_v60 }
 0x9e1   : > { %v1209_v62 = vadd.f32 %v1207_v35, %v1926_v9 }
 0x9e2   : > { %v1208_v10 = vadd.f32 %v1206_v43, %v1929_v54 }
 0x9e3   : > { %1216 = vrot.lane.b32.xlu2 %v1209_v62, %s1591_s13  ;;  %1211 = vst.msk [vmem:[%s188_s22 + $0x8] sm:$0xff] %vm354_vm5, %v1209_v62 }
 0x9e4   : > { %1214 = vrot.lane.b32.xlu1 %v1208_v10, %s1591_s13  ;;  %1210 = vst.msk [vmem:[%s188_s22] sm:$0xff] %vm354_vm5, %v1208_v10 }
 0xa3d   : > { %v1217_v59 = vpop.permute.xlu2 %1216 }
 0xa3e   : > { %1391 = vst.msk [vmem:[%s188_s22 + $0x18] sm:$0xff] %vm354_vm5, %v1217_v59 }
 0xa56   : > { %v1215_v9 = vpop.permute.xlu1 %1214 }
 0xa57   : > { %1390 = vst.msk [vmem:[%s188_s22 + $0x10] sm:$0xff] %vm354_vm5, %v1215_v9 }
 0xa58   : > { %1537 = shalt.err (!%p1534_p3)
}
 0xa59   : > { %s1592_s11 = smov 128   ;;  %s1593_s12 = smov 8  }
 0xa5a   : > { %1411 = dma.vmem_to_hbm [thread:$0]  (%p1657_p5), %s1237_s5, 512, %s1239_s6, %s1224_s7, %s1592_s11, %s1592_s11, %s1593_s12  }
 0xa5b PF: > { %p1417_p4 = scmp.ge.s32.totalorder %s1572_s18, 2  ;;  %s1253_s13 = sand.u32 1, %s1560_s15  }
 0xa5c   : > { %s1254_s22 = scalar_lea.sflag [#allocation3], %s1253_s13 }
 0xa5d   : > { %p1414_p7 = pnand %p1417_p4, %p1661_p6 }
 0xa5f   : > { %p1415_p8 = pneg %p1414_p7 }
 0xa61   : > { %1555 = dma.done.wait (%p1415_p8), %s1254_s22, 512  }
 0xa62   : > { %1557 = vsyncadd (%p1415_p8), %s1254_s22, 4294966784  ;;  %p14_p9 = scmp.ge.s32.totalorder %s1644_s21, 4   ;;  %s2068_s15 = smov %s1564_s16 }
 0xa63   : > { %s2069_s16 = smov %s1568_s17  ;;  %s2070_s17 = smov %s1655_s24 }
 0xa64   : > { %s2071_s18 = smov %s1644_s21  ;;  %16 = sbr.rel (!%p14_p9) target bundleno = 3 (0x3), region = 74 }
 0xa69   :  { %1260 = vsyncpa [#allocation3], 1 }
 0xa6a   :  { %1262 = vsyncpa [#allocation3 + $0x1], 1 }

</bundles_post_ra>
